<compile_context>
chip_gen: v6e
topology: v6e:2x2x1
jax: 0.10.0
libtpu: 0.0.40
codegen_flags: <defaults>
</compile_context>

<pallas_src>
import functools

import jax
import jax.numpy as jnp
from jax.experimental import pallas as pl
from jax.experimental.pallas import tpu as pltpu


def _round_up(x, m):
    return (x + m - 1) // m * m


_SUB = 8        # timesteps per input-projection sub-chunk (inner unrolled window)
_MAX_TC = 512   # hard cap on timesteps per grid step


def _vmem_budget_bytes():
    """Per-chip VMEM budget (leaves ~25% headroom for the compiler)."""
    try:
        cap = int(pltpu.get_tpu_info().vmem_capacity_bytes)
    except Exception:
        cap = 64 * 1024 * 1024          # conservative: v7x per-core VMEM
    return int(cap * 3 // 4)            # ~48 MiB on v7x, ~96 MiB on v5e/v6e


def _choose_tc(T, bt, ip, hpad, x_isz, w_isz, hout_isz, max_tc, extra_fixed=0):
    """Pick the largest time-chunk that fits the VMEM budget."""
    budget = _vmem_budget_bytes()
    g4 = 4 * hpad
    fixed = (ip + hpad) * g4 * w_isz + g4 * 4      # single-buffered weights + bias
    fixed += 2 * bt * hpad * 4                     # h, c state (f32)
    fixed += _SUB * bt * g4 * 4                    # xg sub-chunk temporary (f32)
    fixed += extra_fixed
    per_t = 2 * bt * ip * x_isz                    # double-buffered input chunk
    per_t += 2 * bt * hpad * hout_isz              # double-buffered hseq out (0 if none)
    avail = budget - fixed - (4 << 20)             # headroom
    tc = avail // per_t if avail > per_t else _SUB
    tc = int(max(1, min(tc, _MAX_TC, T)))
    if max_tc is not None:
        tc = max(1, min(tc, max_tc))
    if tc > _SUB:
        tc -= tc % _SUB                            # full chunks are whole sub-chunks
    return tc


# ---------------------------------------------------------------------------
# Kernels
# ---------------------------------------------------------------------------
def _lstm_chunk_body(x_ref, wih_ref, whh_ref, b_ref, h_sc, c_sc, hseq_ref,
                     *, hpad, tc, t_total):
    """Per-chunk body: sub-chunked input projection + sequential recurrence.

    x_ref   : (tc, bt, Ip)     chunk of the (padded) time-major input
    wih_ref : (Ip, 4*Hp)       W_ih^T, gate-padded (compute dtype)
    whh_ref : (Hp, 4*Hp)       W_hh^T, gate-padded (compute dtype)
    b_ref   : (1, 4*Hp)        b_ih + b_hh, gate-padded (f32)
    h_sc,c_sc: (bt, Hp)        recurrent state (f32), persists across grid steps
    hseq_ref: (tc, bt, Hp) or None -- hidden-sequence output (None for last layer)
    """
    step = pl.program_id(1)        # time-chunk axis (batch-tile axis is axis 0)

    @pl.when(step == 0)
    def _():
        h_sc[...] = jnp.zeros_like(h_sc)
        c_sc[...] = jnp.zeros_like(c_sc)

    bt = h_sc.shape[0]
    ip = x_ref.shape[2]
    cdt = wih_ref.dtype            # matmul compute dtype (f32 or bf16)

    def do_group(base, count):
        # (1) Hoisted input projection: ONE MXU matmul for `count` timesteps.
        xb = x_ref[pl.ds(base, count)]                          # (count, bt, ip)
        x2d = xb.reshape(count * bt, ip).astype(cdt)
        xg = jnp.dot(x2d, wih_ref[...], preferred_element_type=jnp.float32)
        xg = xg + b_ref[...]                                    # (count*bt, 4*Hp)
        # (2) Sequential recurrence, statically unrolled over the sub-chunk.
        for t in range(count):
            xg_t = xg[t * bt:(t + 1) * bt, :]
            gates = xg_t + jnp.dot(h_sc[...].astype(cdt), whh_ref[...],
                                   preferred_element_type=jnp.float32)
            # Lane-aligned gate slices (Hp is a multiple of 128).
            i_g = jax.nn.sigmoid(gates[:, 0 * hpad:1 * hpad])
            f_g = jax.nn.sigmoid(gates[:, 1 * hpad:2 * hpad])
            g_g = jnp.tanh(gates[:, 2 * hpad:3 * hpad])
            o_g = jax.nn.sigmoid(gates[:, 3 * hpad:4 * hpad])
            c_new = f_g * c_sc[...] + i_g * g_g
            h_new = o_g * jnp.tanh(c_new)
            c_sc[...] = c_new
            h_sc[...] = h_new
            if hseq_ref is not None:
                hseq_ref[base + t] = h_new.astype(hseq_ref.dtype)

    def process_steps(n_steps):
        n_groups = n_steps // _SUB
        tail = n_steps % _SUB
        if n_groups == 1:
            do_group(0, _SUB)
        elif n_groups > 1:
            @pl.loop(0, n_groups)
            def _(gi):
                do_group(pl.multiple_of(gi * _SUB, _SUB), _SUB)
        if tail:
            do_group(n_groups * _SUB, tail)

    # Remainder handling hoisted to chunk level: full chunks run the straight-
    # line path; only the final partial chunk runs a shorter loop.
    n_full = t_total // tc
    rem = t_total % tc
    if rem:
        @pl.when(step < n_full)
        def _():
            process_steps(tc)

        @pl.when(step == n_full)
        def _():
            process_steps(rem)
    else:
        process_steps(tc)


def _lstm_seq_kernel(x_ref, wih_ref, whh_ref, b_ref, hseq_ref, h_sc, c_sc,
                     *, hpad, tc, t_total):
    """Intermediate layer: writes the hidden sequence (consumed by next layer)."""
    _lstm_chunk_body(x_ref, wih_ref, whh_ref, b_ref, h_sc, c_sc, hseq_ref,
                     hpad=hpad, tc=tc, t_total=t_total)


def _lstm_last_fc_kernel(x_ref, wih_ref, whh_ref, b_ref, wfc_ref, bfc_ref,
                         out_ref, h_sc, c_sc, *, hpad, tc, t_total):
    """Last layer: no hidden-sequence writeback; FC fused on the final step."""
    _lstm_chunk_body(x_ref, wih_ref, whh_ref, b_ref, h_sc, c_sc, None,
                     hpad=hpad, tc=tc, t_total=t_total)

    @pl.when(pl.program_id(1) == pl.num_programs(1) - 1)
    def _():
        out_ref[...] = (
            jnp.dot(h_sc[...].astype(wfc_ref.dtype), wfc_ref[...],
                    preferred_element_type=jnp.float32)
            + bfc_ref[...]
        ).astype(out_ref.dtype)


# ---------------------------------------------------------------------------
# pallas_call wrappers
# ---------------------------------------------------------------------------
def _compiler_params():
    return pltpu.CompilerParams(
        dimension_semantics=("parallel", "arbitrary"),   # batch tiles ∥, time serial
        vmem_limit_bytes=_vmem_budget_bytes())


def _run_lstm_layer_seq(x_tbi, w_ih_t, w_hh_t, bias, *, hpad, bt, out_dtype, max_tc):
    """x_tbi: (T, Bp, Ip) -> hidden sequence (T, Bp, Hp) in out_dtype."""
    T, Bp, Ip = x_tbi.shape
    G = 4 * hpad
    nb = Bp // bt
    x_isz = jnp.dtype(x_tbi.dtype).itemsize
    w_isz = jnp.dtype(w_ih_t.dtype).itemsize
    h_isz = jnp.dtype(out_dtype).itemsize
    tc = _choose_tc(T, bt, Ip, hpad, x_isz, w_isz, h_isz, max_tc)
    n_chunks = pl.cdiv(T, tc)

    grid_spec = pltpu.PrefetchScalarGridSpec(
        num_scalar_prefetch=0,
        grid=(nb, n_chunks),
        in_specs=[
            pl.BlockSpec((tc, bt, Ip), lambda b, s: (s, b, 0)),
            pl.BlockSpec((Ip, G), lambda b, s: (0, 0), pipeline_mode=pl.Buffered(1)),
            pl.BlockSpec((hpad, G), lambda b, s: (0, 0), pipeline_mode=pl.Buffered(1)),
            pl.BlockSpec((1, G), lambda b, s: (0, 0), pipeline_mode=pl.Buffered(1)),
        ],
        out_specs=pl.BlockSpec((tc, bt, hpad), lambda b, s: (s, b, 0)),
        scratch_shapes=[
            pltpu.VMEM((bt, hpad), jnp.float32),       # h
            pltpu.VMEM((bt, hpad), jnp.float32),       # c
        ],
    )
    kernel = functools.partial(_lstm_seq_kernel, hpad=hpad, tc=tc, t_total=T)
    return pl.pallas_call(
        kernel,
        out_shape=jax.ShapeDtypeStruct((T, Bp, hpad), out_dtype),
        grid_spec=grid_spec,
        compiler_params=_compiler_params(),
    )(x_tbi, w_ih_t, w_hh_t, bias)


def _run_lstm_last_layer_fc(x_tbi, w_ih_t, w_hh_t, bias, w_fc_t, b_fc,
                            *, hpad, bt, max_tc):
    """x_tbi: (T, Bp, Ip) -> fc(last hidden state): (Bp, Op) f32."""
    T, Bp, Ip = x_tbi.shape
    G = 4 * hpad
    Op = w_fc_t.shape[1]
    nb = Bp // bt
    x_isz = jnp.dtype(x_tbi.dtype).itemsize
    w_isz = jnp.dtype(w_ih_t.dtype).itemsize
    extra = hpad * Op * jnp.dtype(w_fc_t.dtype).itemsize + Op * 4 + 2 * bt * Op * 4
    tc = _choose_tc(T, bt, Ip, hpad, x_isz, w_isz, 0, max_tc, extra)
    n_chunks = pl.cdiv(T, tc)

    grid_spec = pltpu.PrefetchScalarGridSpec(
        num_scalar_prefetch=0,
        grid=(nb, n_chunks),
        in_specs=[
            pl.BlockSpec((tc, bt, Ip), lambda b, s: (s, b, 0)),
            pl.BlockSpec((Ip, G), lambda b, s: (0, 0), pipeline_mode=pl.Buffered(1)),
            pl.BlockSpec((hpad, G), lambda b, s: (0, 0), pipeline_mode=pl.Buffered(1)),
            pl.BlockSpec((1, G), lambda b, s: (0, 0), pipeline_mode=pl.Buffered(1)),
            pl.BlockSpec((hpad, Op), lambda b, s: (0, 0), pipeline_mode=pl.Buffered(1)),
            pl.BlockSpec((1, Op), lambda b, s: (0, 0), pipeline_mode=pl.Buffered(1)),
        ],
        out_specs=pl.BlockSpec((bt, Op), lambda b, s: (b, 0)),
        scratch_shapes=[
            pltpu.VMEM((bt, hpad), jnp.float32),       # h
            pltpu.VMEM((bt, hpad), jnp.float32),       # c
        ],
    )
    kernel = functools.partial(_lstm_last_fc_kernel, hpad=hpad, tc=tc, t_total=T)
    return pl.pallas_call(
        kernel,
        out_shape=jax.ShapeDtypeStruct((Bp, Op), jnp.float32),
        grid_spec=grid_spec,
        compiler_params=_compiler_params(),
    )(x_tbi, w_ih_t, w_hh_t, bias, w_fc_t, b_fc)


# ---------------------------------------------------------------------------
# Parameter init (PyTorch layout) and one-time preparation (pad / transpose)
# ---------------------------------------------------------------------------
def init_params(key, input_size, hidden_size, output_size, num_layers):
    """Uniform(-1/sqrt(H), 1/sqrt(H)) init, like PyTorch defaults."""
    params = {"layers": []}
    bound = 1.0 / jnp.sqrt(jnp.float32(hidden_size))
    in_sz = input_size
    for _ in range(num_layers):
        key, k1, k2, k3, k4 = jax.random.split(key, 5)
        w_ih = jax.random.uniform(k1, (4 * hidden_size, in_sz), jnp.float32, -bound, bound)
        w_hh = jax.random.uniform(k2, (4 * hidden_size, hidden_size), jnp.float32, -bound, bound)
        b_ih = jax.random.uniform(k3, (4 * hidden_size,), jnp.float32, -bound, bound)
        b_hh = jax.random.uniform(k4, (4 * hidden_size,), jnp.float32, -bound, bound)
        params["layers"].append({"w_ih": w_ih, "w_hh": w_hh, "b_ih": b_ih, "b_hh": b_hh})
        in_sz = hidden_size
    key, k5, k6 = jax.random.split(key, 3)
    params["fc_w"] = jax.random.uniform(k5, (output_size, hidden_size), jnp.float32, -bound, bound)
    params["fc_b"] = jax.random.uniform(k6, (output_size,), jnp.float32, -bound, bound)
    return params


def _pad_gate_weight(w, H, Hp, in_dim, Ip, dtype):
    """(4H, in) PyTorch weight -> gate-padded, transposed (Ip, 4*Hp)."""
    w4 = w.reshape(4, H, in_dim)
    w4 = jnp.pad(w4, ((0, 0), (0, Hp - H), (0, Ip - in_dim)))
    return jnp.transpose(w4, (2, 0, 1)).reshape(Ip, 4 * Hp).astype(dtype)


def _pad_gate_bias(b, H, Hp):
    b4 = jnp.pad(b.reshape(4, H), ((0, 0), (0, Hp - H)))
    return b4.reshape(1, 4 * Hp).astype(jnp.float32)


def prepare_params(params, compute_dtype=jnp.float32):
    """One-time weight prep: transpose, combine biases, pad gates to lane-dense
    widths, cast matmul operands to the compute dtype (f32 or bf16)."""
    layers = params["layers"]
    H = layers[0]["w_hh"].shape[1]
    Hp = _round_up(H, 128)
    prepared_layers = []
    for layer in layers:
        in_dim = layer["w_ih"].shape[1]
        Ip = _round_up(in_dim, 128)
        prepared_layers.append({
            "w_ih_t": _pad_gate_weight(layer["w_ih"], H, Hp, in_dim, Ip, compute_dtype),
            "w_hh_t": _pad_gate_weight(layer["w_hh"], H, Hp, H, Hp, compute_dtype),
            "bias": _pad_gate_bias(layer["b_ih"] + layer["b_hh"], H, Hp),
        })
    O = params["fc_w"].shape[0]
    Op = _round_up(O, 128)
    fc_w_t = jnp.pad(jnp.transpose(params["fc_w"]), ((0, Hp - H), (0, Op - O)))
    fc_b = jnp.pad(params["fc_b"], (0, Op - O)).reshape(1, Op)
    return {
        "layers": prepared_layers,
        "fc_w_t": fc_w_t.astype(compute_dtype),
        "fc_b": fc_b.astype(jnp.float32),
    }


# ---------------------------------------------------------------------------
# Forward
# ---------------------------------------------------------------------------
@functools.partial(jax.jit, static_argnames=("output_size", "max_time_chunk"))
def lstm_model_forward(prepared, x, *, output_size, max_time_chunk=None):
    """Pallas implementation of LSTMModel.forward.

    x: (B, T, input_size) or (B, input_size)  -> returns (B, output_size) f32.
    """
    if x.ndim == 2:                       # mirrors x.unsqueeze(1) in PyTorch
        x = x[:, None, :]
    layers = prepared["layers"]
    cdt = layers[0]["w_ih_t"].dtype       # compute dtype (f32 or bf16)
    hpad = layers[0]["w_hh_t"].shape[0]
    Ip0 = layers[0]["w_ih_t"].shape[0]
    B, T, I = x.shape
    Bp = _round_up(B, 8)

    # Batch tile: split across grid (and v7x's two TensorCores) only when each
    # tile keeps >= 256 rows; otherwise keep the whole batch in one tile.
    if Bp >= 512 and Bp % 16 == 0:
        bt = Bp // 2
    else:
        bt = Bp

    # time-major, compute dtype, pad batch (sublanes) and feature (lanes) dims
    h = jnp.transpose(x.astype(cdt), (1, 0, 2))                 # (T, B, I)
    h = jnp.pad(h, ((0, 0), (0, Bp - B), (0, Ip0 - I)))         # (T, Bp, Ip0)

    for layer in layers[:-1]:
        h = _run_lstm_layer_seq(h, layer["w_ih_t"], layer["w_hh_t"],
                                layer["bias"], hpad=hpad, bt=bt,
                                out_dtype=cdt, max_tc=max_time_chunk)

    last = layers[-1]
    out_p = _run_lstm_last_layer_fc(h, last["w_ih_t"], last["w_hh_t"],
                                    last["bias"], prepared["fc_w_t"],
                                    prepared["fc_b"], hpad=hpad, bt=bt,
                                    max_tc=max_time_chunk)
    return out_p[:B, :output_size]


# ---------------------------------------------------------------------------
# Pure-JAX reference (for correctness check)
# ---------------------------------------------------------------------------
def lstm_model_ref(params, x):
    if x.ndim == 2:
        x = x[:, None, :]
    x = x.astype(jnp.float32)
    B, T, _ = x.shape
    seq = x
    for layer in params["layers"]:
        H = layer["w_hh"].shape[1]
        h = jnp.zeros((B, H), jnp.float32)
        c = jnp.zeros((B, H), jnp.float32)
        outs = []
        for t in range(T):
            gates = seq[:, t, :] @ layer["w_ih"].T + h @ layer["w_hh"].T \
                    + layer["b_ih"] + layer["b_hh"]
            i_g = jax.nn.sigmoid(gates[:, 0 * H:1 * H])
            f_g = jax.nn.sigmoid(gates[:, 1 * H:2 * H])
            g_g = jnp.tanh(gates[:, 2 * H:3 * H])
            o_g = jax.nn.sigmoid(gates[:, 3 * H:4 * H])
            c = f_g * c + i_g * g_g
            h = o_g * jnp.tanh(c)
            outs.append(h)
        seq = jnp.stack(outs, axis=1)
    return seq[:, -1, :] @ params["fc_w"].T + params["fc_b"]


# ---------------------------------------------------------------------------
if __name__ == "__main__":
    B, T = 2, 8
    input_size, hidden_size, output_size = 16, 32, 4

    key = jax.random.PRNGKey(0)
    key, kx, kp = jax.random.split(key, 3)
    x = jax.random.normal(kx, (B, T, input_size), dtype=jnp.float32)

    # A) single-layer model, f32 (fused last-layer + FC kernel), strict check
    params1 = init_params(kp, input_size, hidden_size, output_size, 1)
    prep1_f32 = prepare_params(params1)
    out = jax.block_until_ready(lstm_model_forward(prep1_f32, x, output_size=output_size))
    ref = lstm_model_ref(params1, x)
    assert out.shape == (B, output_size), out.shape
    assert jnp.allclose(out, ref, atol=1e-4, rtol=1e-4), \
        f"A max err {jnp.max(jnp.abs(out - ref))}"

    # B) two-layer model, f32 (exercises the hidden-sequence kernel path)
    params2 = init_params(kp, input_size, hidden_size, output_size, 2)
    prep2_f32 = prepare_params(params2)
    out2 = jax.block_until_ready(lstm_model_forward(prep2_f32, x, output_size=output_size))
    ref2 = lstm_model_ref(params2, x)
    assert jnp.allclose(out2, ref2, atol=1e-4, rtol=1e-4), \
        f"B max err {jnp.max(jnp.abs(out2 - ref2))}"

    # C) 2-D input path (x.unsqueeze(1) behaviour, T=1)
    x2d = jax.random.normal(kx, (B, input_size), dtype=jnp.float32)
    out3 = jax.block_until_ready(lstm_model_forward(prep1_f32, x2d, output_size=output_size))
    ref3 = lstm_model_ref(params1, x2d)
    assert jnp.allclose(out3, ref3, atol=1e-4, rtol=1e-4), \
        f"C max err {jnp.max(jnp.abs(out3 - ref3))}"

    # D) T % tc remainder + multi-sub-chunk path (T=20, forced tc=16), 2 layers, f32
    xd = jax.random.normal(kx, (B, 20, input_size), dtype=jnp.float32)
    out4 = jax.block_until_ready(
        lstm_model_forward(prep2_f32, xd, output_size=output_size, max_time_chunk=16))
    ref4 = lstm_model_ref(params2, xd)
    assert jnp.allclose(out4, ref4, atol=1e-4, rtol=1e-4), \
        f"D max err {jnp.max(jnp.abs(out4 - ref4))}"

    # E) bf16 compute path (bf16 MXU matmuls, bf16 inter-layer hseq), loose tol
    prep2_bf16 = prepare_params(params2, compute_dtype=jnp.bfloat16)
    out5 = jax.block_until_ready(lstm_model_forward(prep2_bf16, x, output_size=output_size))
    assert jnp.allclose(out5, ref2, atol=1e-1, rtol=1e-1), \
        f"E max err {jnp.max(jnp.abs(out5 - ref2))}"

    # F) large padded batch -> batch-tile "parallel" grid axis (nb=2), f32
    xf = jax.random.normal(kx, (512, 4, input_size), dtype=jnp.float32)
    out6 = jax.block_until_ready(lstm_model_forward(prep1_f32, xf, output_size=output_size))
    ref6 = lstm_model_ref(params1, xf)
    assert jnp.allclose(out6, ref6, atol=1e-4, rtol=1e-4), \
        f"F max err {jnp.max(jnp.abs(out6 - ref6))}"

    print("KERNEL_OK")
</pallas_src>

<mosaic_0001>
module attributes {stable_mosaic.version = 11 : i64} {
  func.func @_lstm_last_fc_kernel(%arg0: i32, %arg1: i32, %arg2: memref<8x8x128xf32, #tpu.memory_space<vmem>>, %arg3: memref<128x512xf32, #tpu.memory_space<vmem>>, %arg4: memref<128x512xf32, #tpu.memory_space<vmem>>, %arg5: memref<1x512xf32, #tpu.memory_space<vmem>>, %arg6: memref<128x128xf32, #tpu.memory_space<vmem>>, %arg7: memref<1x128xf32, #tpu.memory_space<vmem>>, %arg8: memref<8x128xf32, #tpu.memory_space<vmem>>, %arg9: memref<8x128xf32, #tpu.memory_space<vmem>>, %arg10: memref<8x128xf32, #tpu.memory_space<vmem>>) attributes {dimension_semantics = [#tpu.dimension_semantics<parallel>, #tpu.dimension_semantics<arbitrary>], iteration_bounds = array<i64: 1, 1>, scalar_prefetch = 0 : i64, scratch_operands = 2 : i64, tpu.core_type = #tpu.core_type<tc>, window_params = [{transform_indices = @transform_0, window_bounds = array<i64: 8, 8, 128>}, {pipeline_mode = #tpu.pipeline_mode<synchronous>, transform_indices = @transform_1, window_bounds = array<i64: 128, 512>}, {pipeline_mode = #tpu.pipeline_mode<synchronous>, transform_indices = @transform_2, window_bounds = array<i64: 128, 512>}, {pipeline_mode = #tpu.pipeline_mode<synchronous>, transform_indices = @transform_3, window_bounds = array<i64: 1, 512>}, {pipeline_mode = #tpu.pipeline_mode<synchronous>, transform_indices = @transform_4, window_bounds = array<i64: 128, 128>}, {pipeline_mode = #tpu.pipeline_mode<synchronous>, transform_indices = @transform_5, window_bounds = array<i64: 1, 128>}, {transform_indices = @transform_6, window_bounds = array<i64: 8, 128>}]} {
    %c0_i32 = arith.constant 0 : i32
    %0 = arith.cmpi eq, %arg1, %c0_i32 : i32
    %1 = arith.extui %0 : i1 to i32
    %c0_i32_0 = arith.constant 0 : i32
    %2 = arith.cmpi ne, %1, %c0_i32_0 : i32
    scf.if %2 {
      %cst_121 = arith.constant 0.000000e+00 : f32
      %277 = vector.broadcast %cst_121 : f32 to vector<8x128xf32>
      %c0_122 = arith.constant 0 : index
      %c0_123 = arith.constant 0 : index
      %278 = vector.load %arg9[%c0_122, %c0_123] : memref<8x128xf32, #tpu.memory_space<vmem>>, vector<8x128xf32>
      tpu.vector_store %arg9[%c0_122, %c0_123], %277 {strides = array<i32>} : memref<8x128xf32, #tpu.memory_space<vmem>>, vector<8x128xf32>,
      %cst_124 = arith.constant 0.000000e+00 : f32
      %279 = vector.broadcast %cst_124 : f32 to vector<8x128xf32>
      %c0_125 = arith.constant 0 : index
      %c0_126 = arith.constant 0 : index
      %280 = vector.load %arg10[%c0_125, %c0_126] : memref<8x128xf32, #tpu.memory_space<vmem>>, vector<8x128xf32>
      tpu.vector_store %arg10[%c0_125, %c0_126], %279 {strides = array<i32>} : memref<8x128xf32, #tpu.memory_space<vmem>>, vector<8x128xf32>,
    } else {
    }
    %c0 = arith.constant 0 : index
    %c0_1 = arith.constant 0 : index
    %c0_2 = arith.constant 0 : index
    %3 = vector.load %arg2[%c0, %c0_1, %c0_2] : memref<8x8x128xf32, #tpu.memory_space<vmem>>, vector<8x8x128xf32>
    %4 = vector.shape_cast %3 : vector<8x8x128xf32> to vector<64x128xf32>
    %c0_3 = arith.constant 0 : index
    %c0_4 = arith.constant 0 : index
    %5 = vector.load %arg3[%c0_3, %c0_4] : memref<128x512xf32, #tpu.memory_space<vmem>>, vector<128x512xf32>
    %cst = arith.constant dense<0.000000e+00> : vector<64x512xf32>
    %6 = tpu.matmul %4, %5, %cst {dimension_numbers = #tpu.dot_dimension_numbers<[1], [0], [0], [1], [0, 0, 1, 1], [], []>} : vector<64x128xf32>, vector<128x512xf32>, vector<64x512xf32> -> vector<64x512xf32>
    %c0_5 = arith.constant 0 : index
    %c0_6 = arith.constant 0 : index
    %7 = vector.load %arg5[%c0_5, %c0_6] : memref<1x512xf32, #tpu.memory_space<vmem>>, vector<1x512xf32>
    %8 = vector.broadcast %7 : vector<1x512xf32> to vector<64x512xf32>
    %9 = arith.addf %6, %8 : vector<64x512xf32>
    %10 = vector.extract_strided_slice %9 {offsets = [0, 0], sizes = [8, 512], strides = [1, 1]} : vector<64x512xf32> to vector<8x512xf32>
    %c0_7 = arith.constant 0 : index
    %c0_8 = arith.constant 0 : index
    %11 = vector.load %arg9[%c0_7, %c0_8] : memref<8x128xf32, #tpu.memory_space<vmem>>, vector<8x128xf32>
    %c0_9 = arith.constant 0 : index
    %c0_10 = arith.constant 0 : index
    %12 = vector.load %arg4[%c0_9, %c0_10] : memref<128x512xf32, #tpu.memory_space<vmem>>, vector<128x512xf32>
    %cst_11 = arith.constant dense<0.000000e+00> : vector<8x512xf32>
    %13 = tpu.matmul %11, %12, %cst_11 {dimension_numbers = #tpu.dot_dimension_numbers<[1], [0], [0], [1], [0, 0, 1, 1], [], []>} : vector<8x128xf32>, vector<128x512xf32>, vector<8x512xf32> -> vector<8x512xf32>
    %14 = arith.addf %10, %13 : vector<8x512xf32>
    %15 = vector.extract_strided_slice %14 {offsets = [0, 0], sizes = [8, 128], strides = [1, 1]} : vector<8x512xf32> to vector<8x128xf32>
    %16 = arith.negf %15 : vector<8x128xf32>
    %17 = math.exp %16 : vector<8x128xf32>
    %cst_12 = arith.constant 1.000000e+00 : f32
    %18 = vector.broadcast %cst_12 : f32 to vector<8x128xf32>
    %19 = arith.addf %18, %17 : vector<8x128xf32>
    %20 = arith.divf %18, %19 : vector<8x128xf32>
    %21 = vector.extract_strided_slice %14 {offsets = [0, 128], sizes = [8, 128], strides = [1, 1]} : vector<8x512xf32> to vector<8x128xf32>
    %22 = arith.negf %21 : vector<8x128xf32>
    %23 = math.exp %22 : vector<8x128xf32>
    %cst_13 = arith.constant 1.000000e+00 : f32
    %24 = vector.broadcast %cst_13 : f32 to vector<8x128xf32>
    %25 = arith.addf %24, %23 : vector<8x128xf32>
    %26 = arith.divf %24, %25 : vector<8x128xf32>
    %27 = vector.extract_strided_slice %14 {offsets = [0, 256], sizes = [8, 128], strides = [1, 1]} : vector<8x512xf32> to vector<8x128xf32>
    %28 = math.tanh %27 : vector<8x128xf32>
    %29 = vector.extract_strided_slice %14 {offsets = [0, 384], sizes = [8, 128], strides = [1, 1]} : vector<8x512xf32> to vector<8x128xf32>
    %30 = arith.negf %29 : vector<8x128xf32>
    %31 = math.exp %30 : vector<8x128xf32>
    %cst_14 = arith.constant 1.000000e+00 : f32
    %32 = vector.broadcast %cst_14 : f32 to vector<8x128xf32>
    %33 = arith.addf %32, %31 : vector<8x128xf32>
    %34 = arith.divf %32, %33 : vector<8x128xf32>
    %c0_15 = arith.constant 0 : index
    %c0_16 = arith.constant 0 : index
    %35 = vector.load %arg10[%c0_15, %c0_16] : memref<8x128xf32, #tpu.memory_space<vmem>>, vector<8x128xf32>
    %36 = arith.mulf %26, %35 : vector<8x128xf32>
    %37 = arith.mulf %20, %28 : vector<8x128xf32>
    %38 = arith.addf %36, %37 : vector<8x128xf32>
    %39 = math.tanh %38 : vector<8x128xf32>
    %40 = arith.mulf %34, %39 : vector<8x128xf32>
    %c0_17 = arith.constant 0 : index
    %c0_18 = arith.constant 0 : index
    %41 = vector.load %arg10[%c0_17, %c0_18] : memref<8x128xf32, #tpu.memory_space<vmem>>, vector<8x128xf32>
    tpu.vector_store %arg10[%c0_17, %c0_18], %38 {strides = array<i32>} : memref<8x128xf32, #tpu.memory_space<vmem>>, vector<8x128xf32>,
    %c0_19 = arith.constant 0 : index
    %c0_20 = arith.constant 0 : index
    %42 = vector.load %arg9[%c0_19, %c0_20] : memref<8x128xf32, #tpu.memory_space<vmem>>, vector<8x128xf32>
    tpu.vector_store %arg9[%c0_19, %c0_20], %40 {strides = array<i32>} : memref<8x128xf32, #tpu.memory_space<vmem>>, vector<8x128xf32>,
    %43 = vector.extract_strided_slice %9 {offsets = [8, 0], sizes = [8, 512], strides = [1, 1]} : vector<64x512xf32> to vector<8x512xf32>
    %c0_21 = arith.constant 0 : index
    %c0_22 = arith.constant 0 : index
    %44 = vector.load %arg9[%c0_21, %c0_22] : memref<8x128xf32, #tpu.memory_space<vmem>>, vector<8x128xf32>
    %c0_23 = arith.constant 0 : index
    %c0_24 = arith.constant 0 : index
    %45 = vector.load %arg4[%c0_23, %c0_24] : memref<128x512xf32, #tpu.memory_space<vmem>>, vector<128x512xf32>
    %cst_25 = arith.constant dense<0.000000e+00> : vector<8x512xf32>
    %46 = tpu.matmul %44, %45, %cst_25 {dimension_numbers = #tpu.dot_dimension_numbers<[1], [0], [0], [1], [0, 0, 1, 1], [], []>} : vector<8x128xf32>, vector<128x512xf32>, vector<8x512xf32> -> vector<8x512xf32>
    %47 = arith.addf %43, %46 : vector<8x512xf32>
    %48 = vector.extract_strided_slice %47 {offsets = [0, 0], sizes = [8, 128], strides = [1, 1]} : vector<8x512xf32> to vector<8x128xf32>
    %49 = arith.negf %48 : vector<8x128xf32>
    %50 = math.exp %49 : vector<8x128xf32>
    %cst_26 = arith.constant 1.000000e+00 : f32
    %51 = vector.broadcast %cst_26 : f32 to vector<8x128xf32>
    %52 = arith.addf %51, %50 : vector<8x128xf32>
    %53 = arith.divf %51, %52 : vector<8x128xf32>
    %54 = vector.extract_strided_slice %47 {offsets = [0, 128], sizes = [8, 128], strides = [1, 1]} : vector<8x512xf32> to vector<8x128xf32>
    %55 = arith.negf %54 : vector<8x128xf32>
    %56 = math.exp %55 : vector<8x128xf32>
    %cst_27 = arith.constant 1.000000e+00 : f32
    %57 = vector.broadcast %cst_27 : f32 to vector<8x128xf32>
    %58 = arith.addf %57, %56 : vector<8x128xf32>
    %59 = arith.divf %57, %58 : vector<8x128xf32>
    %60 = vector.extract_strided_slice %47 {offsets = [0, 256], sizes = [8, 128], strides = [1, 1]} : vector<8x512xf32> to vector<8x128xf32>
    %61 = math.tanh %60 : vector<8x128xf32>
    %62 = vector.extract_strided_slice %47 {offsets = [0, 384], sizes = [8, 128], strides = [1, 1]} : vector<8x512xf32> to vector<8x128xf32>
    %63 = arith.negf %62 : vector<8x128xf32>
    %64 = math.exp %63 : vector<8x128xf32>
    %cst_28 = arith.constant 1.000000e+00 : f32
    %65 = vector.broadcast %cst_28 : f32 to vector<8x128xf32>
    %66 = arith.addf %65, %64 : vector<8x128xf32>
    %67 = arith.divf %65, %66 : vector<8x128xf32>
    %c0_29 = arith.constant 0 : index
    %c0_30 = arith.constant 0 : index
    %68 = vector.load %arg10[%c0_29, %c0_30] : memref<8x128xf32, #tpu.memory_space<vmem>>, vector<8x128xf32>
    %69 = arith.mulf %59, %68 : vector<8x128xf32>
    %70 = arith.mulf %53, %61 : vector<8x128xf32>
    %71 = arith.addf %69, %70 : vector<8x128xf32>
    %72 = math.tanh %71 : vector<8x128xf32>
    %73 = arith.mulf %67, %72 : vector<8x128xf32>
    %c0_31 = arith.constant 0 : index
    %c0_32 = arith.constant 0 : index
    %74 = vector.load %arg10[%c0_31, %c0_32] : memref<8x128xf32, #tpu.memory_space<vmem>>, vector<8x128xf32>
    tpu.vector_store %arg10[%c0_31, %c0_32], %71 {strides = array<i32>} : memref<8x128xf32, #tpu.memory_space<vmem>>, vector<8x128xf32>,
    %c0_33 = arith.constant 0 : index
    %c0_34 = arith.constant 0 : index
    %75 = vector.load %arg9[%c0_33, %c0_34] : memref<8x128xf32, #tpu.memory_space<vmem>>, vector<8x128xf32>
    tpu.vector_store %arg9[%c0_33, %c0_34], %73 {strides = array<i32>} : memref<8x128xf32, #tpu.memory_space<vmem>>, vector<8x128xf32>,
    %76 = vector.extract_strided_slice %9 {offsets = [16, 0], sizes = [8, 512], strides = [1, 1]} : vector<64x512xf32> to vector<8x512xf32>
    %c0_35 = arith.constant 0 : index
    %c0_36 = arith.constant 0 : index
    %77 = vector.load %arg9[%c0_35, %c0_36] : memref<8x128xf32, #tpu.memory_space<vmem>>, vector<8x128xf32>
    %c0_37 = arith.constant 0 : index
    %c0_38 = arith.constant 0 : index
    %78 = vector.load %arg4[%c0_37, %c0_38] : memref<128x512xf32, #tpu.memory_space<vmem>>, vector<128x512xf32>
    %cst_39 = arith.constant dense<0.000000e+00> : vector<8x512xf32>
    %79 = tpu.matmul %77, %78, %cst_39 {dimension_numbers = #tpu.dot_dimension_numbers<[1], [0], [0], [1], [0, 0, 1, 1], [], []>} : vector<8x128xf32>, vector<128x512xf32>, vector<8x512xf32> -> vector<8x512xf32>
    %80 = arith.addf %76, %79 : vector<8x512xf32>
    %81 = vector.extract_strided_slice %80 {offsets = [0, 0], sizes = [8, 128], strides = [1, 1]} : vector<8x512xf32> to vector<8x128xf32>
    %82 = arith.negf %81 : vector<8x128xf32>
    %83 = math.exp %82 : vector<8x128xf32>
    %cst_40 = arith.constant 1.000000e+00 : f32
    %84 = vector.broadcast %cst_40 : f32 to vector<8x128xf32>
    %85 = arith.addf %84, %83 : vector<8x128xf32>
    %86 = arith.divf %84, %85 : vector<8x128xf32>
    %87 = vector.extract_strided_slice %80 {offsets = [0, 128], sizes = [8, 128], strides = [1, 1]} : vector<8x512xf32> to vector<8x128xf32>
    %88 = arith.negf %87 : vector<8x128xf32>
    %89 = math.exp %88 : vector<8x128xf32>
    %cst_41 = arith.constant 1.000000e+00 : f32
    %90 = vector.broadcast %cst_41 : f32 to vector<8x128xf32>
    %91 = arith.addf %90, %89 : vector<8x128xf32>
    %92 = arith.divf %90, %91 : vector<8x128xf32>
    %93 = vector.extract_strided_slice %80 {offsets = [0, 256], sizes = [8, 128], strides = [1, 1]} : vector<8x512xf32> to vector<8x128xf32>
    %94 = math.tanh %93 : vector<8x128xf32>
    %95 = vector.extract_strided_slice %80 {offsets = [0, 384], sizes = [8, 128], strides = [1, 1]} : vector<8x512xf32> to vector<8x128xf32>
    %96 = arith.negf %95 : vector<8x128xf32>
    %97 = math.exp %96 : vector<8x128xf32>
    %cst_42 = arith.constant 1.000000e+00 : f32
    %98 = vector.broadcast %cst_42 : f32 to vector<8x128xf32>
    %99 = arith.addf %98, %97 : vector<8x128xf32>
    %100 = arith.divf %98, %99 : vector<8x128xf32>
    %c0_43 = arith.constant 0 : index
    %c0_44 = arith.constant 0 : index
    %101 = vector.load %arg10[%c0_43, %c0_44] : memref<8x128xf32, #tpu.memory_space<vmem>>, vector<8x128xf32>
    %102 = arith.mulf %92, %101 : vector<8x128xf32>
    %103 = arith.mulf %86, %94 : vector<8x128xf32>
    %104 = arith.addf %102, %103 : vector<8x128xf32>
    %105 = math.tanh %104 : vector<8x128xf32>
    %106 = arith.mulf %100, %105 : vector<8x128xf32>
    %c0_45 = arith.constant 0 : index
    %c0_46 = arith.constant 0 : index
    %107 = vector.load %arg10[%c0_45, %c0_46] : memref<8x128xf32, #tpu.memory_space<vmem>>, vector<8x128xf32>
    tpu.vector_store %arg10[%c0_45, %c0_46], %104 {strides = array<i32>} : memref<8x128xf32, #tpu.memory_space<vmem>>, vector<8x128xf32>,
    %c0_47 = arith.constant 0 : index
    %c0_48 = arith.constant 0 : index
    %108 = vector.load %arg9[%c0_47, %c0_48] : memref<8x128xf32, #tpu.memory_space<vmem>>, vector<8x128xf32>
    tpu.vector_store %arg9[%c0_47, %c0_48], %106 {strides = array<i32>} : memref<8x128xf32, #tpu.memory_space<vmem>>, vector<8x128xf32>,
    %109 = vector.extract_strided_slice %9 {offsets = [24, 0], sizes = [8, 512], strides = [1, 1]} : vector<64x512xf32> to vector<8x512xf32>
    %c0_49 = arith.constant 0 : index
    %c0_50 = arith.constant 0 : index
    %110 = vector.load %arg9[%c0_49, %c0_50] : memref<8x128xf32, #tpu.memory_space<vmem>>, vector<8x128xf32>
    %c0_51 = arith.constant 0 : index
    %c0_52 = arith.constant 0 : index
    %111 = vector.load %arg4[%c0_51, %c0_52] : memref<128x512xf32, #tpu.memory_space<vmem>>, vector<128x512xf32>
    %cst_53 = arith.constant dense<0.000000e+00> : vector<8x512xf32>
    %112 = tpu.matmul %110, %111, %cst_53 {dimension_numbers = #tpu.dot_dimension_numbers<[1], [0], [0], [1], [0, 0, 1, 1], [], []>} : vector<8x128xf32>, vector<128x512xf32>, vector<8x512xf32> -> vector<8x512xf32>
    %113 = arith.addf %109, %112 : vector<8x512xf32>
    %114 = vector.extract_strided_slice %113 {offsets = [0, 0], sizes = [8, 128], strides = [1, 1]} : vector<8x512xf32> to vector<8x128xf32>
    %115 = arith.negf %114 : vector<8x128xf32>
    %116 = math.exp %115 : vector<8x128xf32>
    %cst_54 = arith.constant 1.000000e+00 : f32
    %117 = vector.broadcast %cst_54 : f32 to vector<8x128xf32>
    %118 = arith.addf %117, %116 : vector<8x128xf32>
    %119 = arith.divf %117, %118 : vector<8x128xf32>
    %120 = vector.extract_strided_slice %113 {offsets = [0, 128], sizes = [8, 128], strides = [1, 1]} : vector<8x512xf32> to vector<8x128xf32>
    %121 = arith.negf %120 : vector<8x128xf32>
    %122 = math.exp %121 : vector<8x128xf32>
    %cst_55 = arith.constant 1.000000e+00 : f32
    %123 = vector.broadcast %cst_55 : f32 to vector<8x128xf32>
    %124 = arith.addf %123, %122 : vector<8x128xf32>
    %125 = arith.divf %123, %124 : vector<8x128xf32>
    %126 = vector.extract_strided_slice %113 {offsets = [0, 256], sizes = [8, 128], strides = [1, 1]} : vector<8x512xf32> to vector<8x128xf32>
    %127 = math.tanh %126 : vector<8x128xf32>
    %128 = vector.extract_strided_slice %113 {offsets = [0, 384], sizes = [8, 128], strides = [1, 1]} : vector<8x512xf32> to vector<8x128xf32>
    %129 = arith.negf %128 : vector<8x128xf32>
    %130 = math.exp %129 : vector<8x128xf32>
    %cst_56 = arith.constant 1.000000e+00 : f32
    %131 = vector.broadcast %cst_56 : f32 to vector<8x128xf32>
    %132 = arith.addf %131, %130 : vector<8x128xf32>
    %133 = arith.divf %131, %132 : vector<8x128xf32>
    %c0_57 = arith.constant 0 : index
    %c0_58 = arith.constant 0 : index
    %134 = vector.load %arg10[%c0_57, %c0_58] : memref<8x128xf32, #tpu.memory_space<vmem>>, vector<8x128xf32>
    %135 = arith.mulf %125, %134 : vector<8x128xf32>
    %136 = arith.mulf %119, %127 : vector<8x128xf32>
    %137 = arith.addf %135, %136 : vector<8x128xf32>
    %138 = math.tanh %137 : vector<8x128xf32>
    %139 = arith.mulf %133, %138 : vector<8x128xf32>
    %c0_59 = arith.constant 0 : index
    %c0_60 = arith.constant 0 : index
    %140 = vector.load %arg10[%c0_59, %c0_60] : memref<8x128xf32, #tpu.memory_space<vmem>>, vector<8x128xf32>
    tpu.vector_store %arg10[%c0_59, %c0_60], %137 {strides = array<i32>} : memref<8x128xf32, #tpu.memory_space<vmem>>, vector<8x128xf32>,
    %c0_61 = arith.constant 0 : index
    %c0_62 = arith.constant 0 : index
    %141 = vector.load %arg9[%c0_61, %c0_62] : memref<8x128xf32, #tpu.memory_space<vmem>>, vector<8x128xf32>
    tpu.vector_store %arg9[%c0_61, %c0_62], %139 {strides = array<i32>} : memref<8x128xf32, #tpu.memory_space<vmem>>, vector<8x128xf32>,
    %142 = vector.extract_strided_slice %9 {offsets = [32, 0], sizes = [8, 512], strides = [1, 1]} : vector<64x512xf32> to vector<8x512xf32>
    %c0_63 = arith.constant 0 : index
    %c0_64 = arith.constant 0 : index
    %143 = vector.load %arg9[%c0_63, %c0_64] : memref<8x128xf32, #tpu.memory_space<vmem>>, vector<8x128xf32>
    %c0_65 = arith.constant 0 : index
    %c0_66 = arith.constant 0 : index
    %144 = vector.load %arg4[%c0_65, %c0_66] : memref<128x512xf32, #tpu.memory_space<vmem>>, vector<128x512xf32>
    %cst_67 = arith.constant dense<0.000000e+00> : vector<8x512xf32>
    %145 = tpu.matmul %143, %144, %cst_67 {dimension_numbers = #tpu.dot_dimension_numbers<[1], [0], [0], [1], [0, 0, 1, 1], [], []>} : vector<8x128xf32>, vector<128x512xf32>, vector<8x512xf32> -> vector<8x512xf32>
    %146 = arith.addf %142, %145 : vector<8x512xf32>
    %147 = vector.extract_strided_slice %146 {offsets = [0, 0], sizes = [8, 128], strides = [1, 1]} : vector<8x512xf32> to vector<8x128xf32>
    %148 = arith.negf %147 : vector<8x128xf32>
    %149 = math.exp %148 : vector<8x128xf32>
    %cst_68 = arith.constant 1.000000e+00 : f32
    %150 = vector.broadcast %cst_68 : f32 to vector<8x128xf32>
    %151 = arith.addf %150, %149 : vector<8x128xf32>
    %152 = arith.divf %150, %151 : vector<8x128xf32>
    %153 = vector.extract_strided_slice %146 {offsets = [0, 128], sizes = [8, 128], strides = [1, 1]} : vector<8x512xf32> to vector<8x128xf32>
    %154 = arith.negf %153 : vector<8x128xf32>
    %155 = math.exp %154 : vector<8x128xf32>
    %cst_69 = arith.constant 1.000000e+00 : f32
    %156 = vector.broadcast %cst_69 : f32 to vector<8x128xf32>
    %157 = arith.addf %156, %155 : vector<8x128xf32>
    %158 = arith.divf %156, %157 : vector<8x128xf32>
    %159 = vector.extract_strided_slice %146 {offsets = [0, 256], sizes = [8, 128], strides = [1, 1]} : vector<8x512xf32> to vector<8x128xf32>
    %160 = math.tanh %159 : vector<8x128xf32>
    %161 = vector.extract_strided_slice %146 {offsets = [0, 384], sizes = [8, 128], strides = [1, 1]} : vector<8x512xf32> to vector<8x128xf32>
    %162 = arith.negf %161 : vector<8x128xf32>
    %163 = math.exp %162 : vector<8x128xf32>
    %cst_70 = arith.constant 1.000000e+00 : f32
    %164 = vector.broadcast %cst_70 : f32 to vector<8x128xf32>
    %165 = arith.addf %164, %163 : vector<8x128xf32>
    %166 = arith.divf %164, %165 : vector<8x128xf32>
    %c0_71 = arith.constant 0 : index
    %c0_72 = arith.constant 0 : index
    %167 = vector.load %arg10[%c0_71, %c0_72] : memref<8x128xf32, #tpu.memory_space<vmem>>, vector<8x128xf32>
    %168 = arith.mulf %158, %167 : vector<8x128xf32>
    %169 = arith.mulf %152, %160 : vector<8x128xf32>
    %170 = arith.addf %168, %169 : vector<8x128xf32>
    %171 = math.tanh %170 : vector<8x128xf32>
    %172 = arith.mulf %166, %171 : vector<8x128xf32>
    %c0_73 = arith.constant 0 : index
    %c0_74 = arith.constant 0 : index
    %173 = vector.load %arg10[%c0_73, %c0_74] : memref<8x128xf32, #tpu.memory_space<vmem>>, vector<8x128xf32>
    tpu.vector_store %arg10[%c0_73, %c0_74], %170 {strides = array<i32>} : memref<8x128xf32, #tpu.memory_space<vmem>>, vector<8x128xf32>,
    %c0_75 = arith.constant 0 : index
    %c0_76 = arith.constant 0 : index
    %174 = vector.load %arg9[%c0_75, %c0_76] : memref<8x128xf32, #tpu.memory_space<vmem>>, vector<8x128xf32>
    tpu.vector_store %arg9[%c0_75, %c0_76], %172 {strides = array<i32>} : memref<8x128xf32, #tpu.memory_space<vmem>>, vector<8x128xf32>,
    %175 = vector.extract_strided_slice %9 {offsets = [40, 0], sizes = [8, 512], strides = [1, 1]} : vector<64x512xf32> to vector<8x512xf32>
    %c0_77 = arith.constant 0 : index
    %c0_78 = arith.constant 0 : index
    %176 = vector.load %arg9[%c0_77, %c0_78] : memref<8x128xf32, #tpu.memory_space<vmem>>, vector<8x128xf32>
    %c0_79 = arith.constant 0 : index
    %c0_80 = arith.constant 0 : index
    %177 = vector.load %arg4[%c0_79, %c0_80] : memref<128x512xf32, #tpu.memory_space<vmem>>, vector<128x512xf32>
    %cst_81 = arith.constant dense<0.000000e+00> : vector<8x512xf32>
    %178 = tpu.matmul %176, %177, %cst_81 {dimension_numbers = #tpu.dot_dimension_numbers<[1], [0], [0], [1], [0, 0, 1, 1], [], []>} : vector<8x128xf32>, vector<128x512xf32>, vector<8x512xf32> -> vector<8x512xf32>
    %179 = arith.addf %175, %178 : vector<8x512xf32>
    %180 = vector.extract_strided_slice %179 {offsets = [0, 0], sizes = [8, 128], strides = [1, 1]} : vector<8x512xf32> to vector<8x128xf32>
    %181 = arith.negf %180 : vector<8x128xf32>
    %182 = math.exp %181 : vector<8x128xf32>
    %cst_82 = arith.constant 1.000000e+00 : f32
    %183 = vector.broadcast %cst_82 : f32 to vector<8x128xf32>
    %184 = arith.addf %183, %182 : vector<8x128xf32>
    %185 = arith.divf %183, %184 : vector<8x128xf32>
    %186 = vector.extract_strided_slice %179 {offsets = [0, 128], sizes = [8, 128], strides = [1, 1]} : vector<8x512xf32> to vector<8x128xf32>
    %187 = arith.negf %186 : vector<8x128xf32>
    %188 = math.exp %187 : vector<8x128xf32>
    %cst_83 = arith.constant 1.000000e+00 : f32
    %189 = vector.broadcast %cst_83 : f32 to vector<8x128xf32>
    %190 = arith.addf %189, %188 : vector<8x128xf32>
    %191 = arith.divf %189, %190 : vector<8x128xf32>
    %192 = vector.extract_strided_slice %179 {offsets = [0, 256], sizes = [8, 128], strides = [1, 1]} : vector<8x512xf32> to vector<8x128xf32>
    %193 = math.tanh %192 : vector<8x128xf32>
    %194 = vector.extract_strided_slice %179 {offsets = [0, 384], sizes = [8, 128], strides = [1, 1]} : vector<8x512xf32> to vector<8x128xf32>
    %195 = arith.negf %194 : vector<8x128xf32>
    %196 = math.exp %195 : vector<8x128xf32>
    %cst_84 = arith.constant 1.000000e+00 : f32
    %197 = vector.broadcast %cst_84 : f32 to vector<8x128xf32>
    %198 = arith.addf %197, %196 : vector<8x128xf32>
    %199 = arith.divf %197, %198 : vector<8x128xf32>
    %c0_85 = arith.constant 0 : index
    %c0_86 = arith.constant 0 : index
    %200 = vector.load %arg10[%c0_85, %c0_86] : memref<8x128xf32, #tpu.memory_space<vmem>>, vector<8x128xf32>
    %201 = arith.mulf %191, %200 : vector<8x128xf32>
    %202 = arith.mulf %185, %193 : vector<8x128xf32>
    %203 = arith.addf %201, %202 : vector<8x128xf32>
    %204 = math.tanh %203 : vector<8x128xf32>
    %205 = arith.mulf %199, %204 : vector<8x128xf32>
    %c0_87 = arith.constant 0 : index
    %c0_88 = arith.constant 0 : index
    %206 = vector.load %arg10[%c0_87, %c0_88] : memref<8x128xf32, #tpu.memory_space<vmem>>, vector<8x128xf32>
    tpu.vector_store %arg10[%c0_87, %c0_88], %203 {strides = array<i32>} : memref<8x128xf32, #tpu.memory_space<vmem>>, vector<8x128xf32>,
    %c0_89 = arith.constant 0 : index
    %c0_90 = arith.constant 0 : index
    %207 = vector.load %arg9[%c0_89, %c0_90] : memref<8x128xf32, #tpu.memory_space<vmem>>, vector<8x128xf32>
    tpu.vector_store %arg9[%c0_89, %c0_90], %205 {strides = array<i32>} : memref<8x128xf32, #tpu.memory_space<vmem>>, vector<8x128xf32>,
    %208 = vector.extract_strided_slice %9 {offsets = [48, 0], sizes = [8, 512], strides = [1, 1]} : vector<64x512xf32> to vector<8x512xf32>
    %c0_91 = arith.constant 0 : index
    %c0_92 = arith.constant 0 : index
    %209 = vector.load %arg9[%c0_91, %c0_92] : memref<8x128xf32, #tpu.memory_space<vmem>>, vector<8x128xf32>
    %c0_93 = arith.constant 0 : index
    %c0_94 = arith.constant 0 : index
    %210 = vector.load %arg4[%c0_93, %c0_94] : memref<128x512xf32, #tpu.memory_space<vmem>>, vector<128x512xf32>
    %cst_95 = arith.constant dense<0.000000e+00> : vector<8x512xf32>
    %211 = tpu.matmul %209, %210, %cst_95 {dimension_numbers = #tpu.dot_dimension_numbers<[1], [0], [0], [1], [0, 0, 1, 1], [], []>} : vector<8x128xf32>, vector<128x512xf32>, vector<8x512xf32> -> vector<8x512xf32>
    %212 = arith.addf %208, %211 : vector<8x512xf32>
    %213 = vector.extract_strided_slice %212 {offsets = [0, 0], sizes = [8, 128], strides = [1, 1]} : vector<8x512xf32> to vector<8x128xf32>
    %214 = arith.negf %213 : vector<8x128xf32>
    %215 = math.exp %214 : vector<8x128xf32>
    %cst_96 = arith.constant 1.000000e+00 : f32
    %216 = vector.broadcast %cst_96 : f32 to vector<8x128xf32>
    %217 = arith.addf %216, %215 : vector<8x128xf32>
    %218 = arith.divf %216, %217 : vector<8x128xf32>
    %219 = vector.extract_strided_slice %212 {offsets = [0, 128], sizes = [8, 128], strides = [1, 1]} : vector<8x512xf32> to vector<8x128xf32>
    %220 = arith.negf %219 : vector<8x128xf32>
    %221 = math.exp %220 : vector<8x128xf32>
    %cst_97 = arith.constant 1.000000e+00 : f32
    %222 = vector.broadcast %cst_97 : f32 to vector<8x128xf32>
    %223 = arith.addf %222, %221 : vector<8x128xf32>
    %224 = arith.divf %222, %223 : vector<8x128xf32>
    %225 = vector.extract_strided_slice %212 {offsets = [0, 256], sizes = [8, 128], strides = [1, 1]} : vector<8x512xf32> to vector<8x128xf32>
    %226 = math.tanh %225 : vector<8x128xf32>
    %227 = vector.extract_strided_slice %212 {offsets = [0, 384], sizes = [8, 128], strides = [1, 1]} : vector<8x512xf32> to vector<8x128xf32>
    %228 = arith.negf %227 : vector<8x128xf32>
    %229 = math.exp %228 : vector<8x128xf32>
    %cst_98 = arith.constant 1.000000e+00 : f32
    %230 = vector.broadcast %cst_98 : f32 to vector<8x128xf32>
    %231 = arith.addf %230, %229 : vector<8x128xf32>
    %232 = arith.divf %230, %231 : vector<8x128xf32>
    %c0_99 = arith.constant 0 : index
    %c0_100 = arith.constant 0 : index
    %233 = vector.load %arg10[%c0_99, %c0_100] : memref<8x128xf32, #tpu.memory_space<vmem>>, vector<8x128xf32>
    %234 = arith.mulf %224, %233 : vector<8x128xf32>
    %235 = arith.mulf %218, %226 : vector<8x128xf32>
    %236 = arith.addf %234, %235 : vector<8x128xf32>
    %237 = math.tanh %236 : vector<8x128xf32>
    %238 = arith.mulf %232, %237 : vector<8x128xf32>
    %c0_101 = arith.constant 0 : index
    %c0_102 = arith.constant 0 : index
    %239 = vector.load %arg10[%c0_101, %c0_102] : memref<8x128xf32, #tpu.memory_space<vmem>>, vector<8x128xf32>
    tpu.vector_store %arg10[%c0_101, %c0_102], %236 {strides = array<i32>} : memref<8x128xf32, #tpu.memory_space<vmem>>, vector<8x128xf32>,
    %c0_103 = arith.constant 0 : index
    %c0_104 = arith.constant 0 : index
    %240 = vector.load %arg9[%c0_103, %c0_104] : memref<8x128xf32, #tpu.memory_space<vmem>>, vector<8x128xf32>
    tpu.vector_store %arg9[%c0_103, %c0_104], %238 {strides = array<i32>} : memref<8x128xf32, #tpu.memory_space<vmem>>, vector<8x128xf32>,
    %241 = vector.extract_strided_slice %9 {offsets = [56, 0], sizes = [8, 512], strides = [1, 1]} : vector<64x512xf32> to vector<8x512xf32>
    %c0_105 = arith.constant 0 : index
    %c0_106 = arith.constant 0 : index
    %242 = vector.load %arg9[%c0_105, %c0_106] : memref<8x128xf32, #tpu.memory_space<vmem>>, vector<8x128xf32>
    %c0_107 = arith.constant 0 : index
    %c0_108 = arith.constant 0 : index
    %243 = vector.load %arg4[%c0_107, %c0_108] : memref<128x512xf32, #tpu.memory_space<vmem>>, vector<128x512xf32>
    %cst_109 = arith.constant dense<0.000000e+00> : vector<8x512xf32>
    %244 = tpu.matmul %242, %243, %cst_109 {dimension_numbers = #tpu.dot_dimension_numbers<[1], [0], [0], [1], [0, 0, 1, 1], [], []>} : vector<8x128xf32>, vector<128x512xf32>, vector<8x512xf32> -> vector<8x512xf32>
    %245 = arith.addf %241, %244 : vector<8x512xf32>
    %246 = vector.extract_strided_slice %245 {offsets = [0, 0], sizes = [8, 128], strides = [1, 1]} : vector<8x512xf32> to vector<8x128xf32>
    %247 = arith.negf %246 : vector<8x128xf32>
    %248 = math.exp %247 : vector<8x128xf32>
    %cst_110 = arith.constant 1.000000e+00 : f32
    %249 = vector.broadcast %cst_110 : f32 to vector<8x128xf32>
    %250 = arith.addf %249, %248 : vector<8x128xf32>
    %251 = arith.divf %249, %250 : vector<8x128xf32>
    %252 = vector.extract_strided_slice %245 {offsets = [0, 128], sizes = [8, 128], strides = [1, 1]} : vector<8x512xf32> to vector<8x128xf32>
    %253 = arith.negf %252 : vector<8x128xf32>
    %254 = math.exp %253 : vector<8x128xf32>
    %cst_111 = arith.constant 1.000000e+00 : f32
    %255 = vector.broadcast %cst_111 : f32 to vector<8x128xf32>
    %256 = arith.addf %255, %254 : vector<8x128xf32>
    %257 = arith.divf %255, %256 : vector<8x128xf32>
    %258 = vector.extract_strided_slice %245 {offsets = [0, 256], sizes = [8, 128], strides = [1, 1]} : vector<8x512xf32> to vector<8x128xf32>
    %259 = math.tanh %258 : vector<8x128xf32>
    %260 = vector.extract_strided_slice %245 {offsets = [0, 384], sizes = [8, 128], strides = [1, 1]} : vector<8x512xf32> to vector<8x128xf32>
    %261 = arith.negf %260 : vector<8x128xf32>
    %262 = math.exp %261 : vector<8x128xf32>
    %cst_112 = arith.constant 1.000000e+00 : f32
    %263 = vector.broadcast %cst_112 : f32 to vector<8x128xf32>
    %264 = arith.addf %263, %262 : vector<8x128xf32>
    %265 = arith.divf %263, %264 : vector<8x128xf32>
    %c0_113 = arith.constant 0 : index
    %c0_114 = arith.constant 0 : index
    %266 = vector.load %arg10[%c0_113, %c0_114] : memref<8x128xf32, #tpu.memory_space<vmem>>, vector<8x128xf32>
    %267 = arith.mulf %257, %266 : vector<8x128xf32>
    %268 = arith.mulf %251, %259 : vector<8x128xf32>
    %269 = arith.addf %267, %268 : vector<8x128xf32>
    %270 = math.tanh %269 : vector<8x128xf32>
    %271 = arith.mulf %265, %270 : vector<8x128xf32>
    %c0_115 = arith.constant 0 : index
    %c0_116 = arith.constant 0 : index
    %272 = vector.load %arg10[%c0_115, %c0_116] : memref<8x128xf32, #tpu.memory_space<vmem>>, vector<8x128xf32>
    tpu.vector_store %arg10[%c0_115, %c0_116], %269 {strides = array<i32>} : memref<8x128xf32, #tpu.memory_space<vmem>>, vector<8x128xf32>,
    %c0_117 = arith.constant 0 : index
    %c0_118 = arith.constant 0 : index
    %273 = vector.load %arg9[%c0_117, %c0_118] : memref<8x128xf32, #tpu.memory_space<vmem>>, vector<8x128xf32>
    tpu.vector_store %arg9[%c0_117, %c0_118], %271 {strides = array<i32>} : memref<8x128xf32, #tpu.memory_space<vmem>>, vector<8x128xf32>,
    %c0_i32_119 = arith.constant 0 : i32
    %274 = arith.cmpi eq, %arg1, %c0_i32_119 : i32
    %275 = arith.extui %274 : i1 to i32
    %c0_i32_120 = arith.constant 0 : i32
    %276 = arith.cmpi ne, %275, %c0_i32_120 : i32
    scf.if %276 {
      %c0_121 = arith.constant 0 : index
      %c0_122 = arith.constant 0 : index
      %277 = vector.load %arg9[%c0_121, %c0_122] : memref<8x128xf32, #tpu.memory_space<vmem>>, vector<8x128xf32>
      %c0_123 = arith.constant 0 : index
      %c0_124 = arith.constant 0 : index
      %278 = vector.load %arg6[%c0_123, %c0_124] : memref<128x128xf32, #tpu.memory_space<vmem>>, vector<128x128xf32>
      %cst_125 = arith.constant dense<0.000000e+00> : vector<8x128xf32>
      %279 = tpu.matmul %277, %278, %cst_125 {dimension_numbers = #tpu.dot_dimension_numbers<[1], [0], [0], [1], [0, 0, 1, 1], [], []>} : vector<8x128xf32>, vector<128x128xf32>, vector<8x128xf32> -> vector<8x128xf32>
      %c0_126 = arith.constant 0 : index
      %c0_127 = arith.constant 0 : index
      %280 = vector.load %arg7[%c0_126, %c0_127] : memref<1x128xf32, #tpu.memory_space<vmem>>, vector<1x128xf32>
      %281 = vector.broadcast %280 : vector<1x128xf32> to vector<8x128xf32>
      %282 = arith.addf %279, %281 : vector<8x128xf32>
      %c0_128 = arith.constant 0 : index
      %c0_129 = arith.constant 0 : index
      %283 = vector.load %arg8[%c0_128, %c0_129] : memref<8x128xf32, #tpu.memory_space<vmem>>, vector<8x128xf32>
      tpu.vector_store %arg8[%c0_128, %c0_129], %282 {strides = array<i32>} : memref<8x128xf32, #tpu.memory_space<vmem>>, vector<8x128xf32>,
    } else {
    }
    return
  }
  func.func @transform_0(%arg0: i32, %arg1: i32) -> (i32, i32, i32) {
    %c0_i32 = arith.constant 0 : i32
    %c0_i32_0 = arith.constant 0 : i32
    return %arg1, %arg0, %c0_i32 : i32, i32, i32
  }
  func.func @transform_1(%arg0: i32, %arg1: i32) -> (i32, i32) {
    %c0_i32 = arith.constant 0 : i32
    %c0_i32_0 = arith.constant 0 : i32
    %c0_i32_1 = arith.constant 0 : i32
    return %c0_i32, %c0_i32_0 : i32, i32
  }
  func.func @transform_2(%arg0: i32, %arg1: i32) -> (i32, i32) {
    %c0_i32 = arith.constant 0 : i32
    %c0_i32_0 = arith.constant 0 : i32
    %c0_i32_1 = arith.constant 0 : i32
    return %c0_i32, %c0_i32_0 : i32, i32
  }
  func.func @transform_3(%arg0: i32, %arg1: i32) -> (i32, i32) {
    %c0_i32 = arith.constant 0 : i32
    %c0_i32_0 = arith.constant 0 : i32
    %c0_i32_1 = arith.constant 0 : i32
    return %c0_i32, %c0_i32_0 : i32, i32
  }
  func.func @transform_4(%arg0: i32, %arg1: i32) -> (i32, i32) {
    %c0_i32 = arith.constant 0 : i32
    %c0_i32_0 = arith.constant 0 : i32
    %c0_i32_1 = arith.constant 0 : i32
    return %c0_i32, %c0_i32_0 : i32, i32
  }
  func.func @transform_5(%arg0: i32, %arg1: i32) -> (i32, i32) {
    %c0_i32 = arith.constant 0 : i32
    %c0_i32_0 = arith.constant 0 : i32
    %c0_i32_1 = arith.constant 0 : i32
    return %c0_i32, %c0_i32_0 : i32, i32
  }
  func.func @transform_6(%arg0: i32, %arg1: i32) -> (i32, i32) {
    %c0_i32 = arith.constant 0 : i32
    %c0_i32_0 = arith.constant 0 : i32
    return %arg0, %c0_i32 : i32, i32
  }
}

</mosaic_0001>

<bundles_post_ra>
// kernel: lstm_model_forward.1
= control target key start
LH: loop header
LB: loop body
LE: loop exit
PB: predicated region body
PF: predicated region fallthrough
CT: control target
= control target key end

     0   :  { %11 = vsyncpa [#allocation5], 0  ;;  %s3661_s0 = inlined_call_operand.vmem [shape: f32[8,8,128], index: 0, kind: input, shape index: {}]   ;;  %s3662_s1 = inlined_call_operand.hbm [shape: f32[128,512], index: 1, kind: input, shape index: {}]   ;;  %s3663_s2 = inlined_call_operand.hbm [shape: f32[128,512], index: 2, kind: input, shape index: {}]   ;;  %s3664_s3 = inlined_call_operand.vmem [shape: f32[1,512], index: 3, kind: input, shape index: {}]   ;;  %s3665_s4 = inlined_call_operand.hbm [shape: f32[128,128], index: 4, kind: input, shape index: {}]   ;;  %s3666_s5 = inlined_call_operand.vmem [shape: f32[1,128], index: 5, kind: input, shape index: {}]   ;;  %s3667_s6 = inlined_call_operand.vmem [shape: f32[8,128], index: 6, kind: output, shape index: {}]  }
   0x1   :  { %12 = vsyncpa [#allocation7], 0  ;;  %s2676_s21 = smov [#allocation6]   ;;  %s2677_s23 = smov [#allocation4]  }
   0x2   :  { %s32_s22 = sshll.u32 %s2676_s21, 4  ;;  %s20_s24 = sshll.u32 %s2677_s23, 4  ;;  %s33_s22 = int_to_ptr.vmem [resolvable:$true] %s32_s22  ;;  %s21_s24 = int_to_ptr.vmem [resolvable:$true] %s20_s24 }
   0x3   :  { %s2620_s25 = scalar_lea.vmem %s33_s22, 8192  ;;  %p2625_p1 = scmp.lt.s32.totalorder %s33_s22, %s33_s22 }
   0x4   :  { %p2621_p0 = scmp.ne.s32.totalorder %s33_s22, %s2620_s25  ;;  %p2626_p2 = scmp.lt.s32.totalorder %s2620_s25, %s2620_s25 }
   0x6   :  { %p2627_p3 = por %p2626_p2, %p2625_p1 }
   0x8   :  { %p2628_p4 = pnand %p2627_p3, %p2621_p0 }
   0xa   :  { %2631 = shalt.err (!%p2628_p4)
}
   0xb   :  { %s2678_s26 = smov 512   ;;  %s2679_s27 = smov 32  }
   0xc   :  { %38 = dma.hbm_to_vmem [thread:$0]  %s3663_s2, 8192, %s33_s22, [#allocation7], %s2678_s26, %s2678_s26, %s2679_s27  }
   0xd   :  { %s2640_s30 = scalar_lea.vmem %s21_s24, 8192  ;;  %p2645_p6 = scmp.lt.s32.totalorder %s21_s24, %s21_s24 }
   0xe   :  { %p2641_p5 = scmp.ne.s32.totalorder %s21_s24, %s2640_s30  ;;  %p2646_p7 = scmp.lt.s32.totalorder %s2640_s30, %s2640_s30 }
  0x10   :  { %p2647_p8 = por %p2646_p7, %p2645_p6 }
  0x12   :  { %p2648_p9 = pnand %p2647_p8, %p2641_p5 }
  0x14   :  { %2651 = shalt.err (!%p2648_p9)
}
  0x15   :  { %26 = dma.hbm_to_vmem [thread:$0]  %s3662_s1, 8192, %s21_s24, [#allocation5], %s2678_s26, %s2678_s26, %s2679_s27  }
  0x16   :  { %s2680_s9 = smov [#allocation8]  }
  0x17   :  { %s46_s10 = sshll.u32 %s2680_s9, 4  ;;  %s47_s10 = int_to_ptr.vmem [resolvable:$true] %s46_s10 }
  0x18   :  { %s2660_s11 = scalar_lea.vmem %s47_s10, 2048  ;;  %p2665_p11 = scmp.lt.s32.totalorder %s47_s10, %s47_s10 }
  0x19   :  { %p2661_p10 = scmp.ne.s32.totalorder %s47_s10, %s2660_s11  ;;  %p2666_p12 = scmp.lt.s32.totalorder %s2660_s11, %s2660_s11 }
  0x1b   :  { %p2667_p13 = por %p2666_p12, %p2665_p11 }
  0x1d   :  { %p2668_p0 = pnand %p2667_p13, %p2661_p10 }
  0x1f   :  { %2671 = shalt.err (!%p2668_p0)
}
  0x20   :  { %s2681_s2 = smov 128   ;;  %s2682_s12 = smov 8  }
  0x21   :  { %52 = dma.hbm_to_vmem [thread:$0]  %s3665_s4, 2048, %s47_s10, [#allocation7], %s2681_s2, %s2681_s2, %s2682_s12  }
  0x22   :  { %2672 = dma.done.wait [#allocation5], 8192  }
  0x23   :  { %2673 = vsyncadd [#allocation5], 4294959104 }
  0x24   :  { %2674 = dma.done.wait [#allocation7], 10240  }
  0x25   :  { %2675 = vsyncadd [#allocation7], 4294957056  ;;  %v3668_v0 = vmov 0.0   ;;  %v139_v1 = vld [vmem:[#allocation4 + $0x1e8] sm:$0xff]  ;;  %v141_v2 = vld [vmem:[#allocation4 + $0x1f8] sm:$0xff]  ;;  %vm2684_vm0 = vmmov 0  }
  0x26   :  { %228 = vmatprep.mubr.f32.mxu0 %v3668_v0  ;;  %341 = vmatprep.mubr.f32.mxu1 %v3668_v0  ;;  %v138_v3 = vld [vmem:[#allocation4 + $0x1e0] sm:$0xff]  ;;  %v140_v4 = vld [vmem:[#allocation4 + $0x1f0] sm:$0xff]  ;;  %v135_v5 = vld [vmem:[#allocation4 + $0x1c8] sm:$0xff] }
  0x27   :  { %164 = vmatprep.subr.mxu0 %v139_v1  ;;  %277 = vmatprep.subr.mxu1 %v141_v2  ;;  %v137_v6 = vld [vmem:[#allocation4 + $0x1d8] sm:$0xff]  ;;  %v134_v7 = vld [vmem:[#allocation4 + $0x1c0] sm:$0xff]  ;;  %v136_v8 = vld [vmem:[#allocation4 + $0x1d0] sm:$0xff] }
  0x28   :  { %165 = vmatpush1.msra.mxu0 %v138_v3  ;;  %278 = vmatpush1.msra.mxu1 %v140_v4  ;;  %v131_v9 = vld [vmem:[#allocation4 + $0x1a8] sm:$0xff]  ;;  %v133_v10 = vld [vmem:[#allocation4 + $0x1b8] sm:$0xff]  ;;  %v130_v11 = vld [vmem:[#allocation4 + $0x1a0] sm:$0xff] }
  0x29   :  { %166 = vmatprep.subr.mxu0 %v135_v5  ;;  %279 = vmatprep.subr.mxu1 %v137_v6  ;;  %v132_v12 = vld [vmem:[#allocation4 + $0x1b0] sm:$0xff]  ;;  %v127_v13 = vld [vmem:[#allocation4 + $0x188] sm:$0xff]  ;;  %v129_v14 = vld [vmem:[#allocation4 + $0x198] sm:$0xff] }
  0x2a   :  { %167 = vmatpush1.msra.mxu0 %v134_v7  ;;  %280 = vmatpush1.msra.mxu1 %v136_v8  ;;  %v126_v15 = vld [vmem:[#allocation4 + $0x180] sm:$0xff]  ;;  %v128_v16 = vld [vmem:[#allocation4 + $0x190] sm:$0xff]  ;;  %v123_v17 = vld [vmem:[#allocation4 + $0x168] sm:$0xff] }
  0x2b   :  { %168 = vmatprep.subr.mxu0 %v131_v9  ;;  %281 = vmatprep.subr.mxu1 %v133_v10  ;;  %v125_v18 = vld [vmem:[#allocation4 + $0x178] sm:$0xff]  ;;  %v122_v19 = vld [vmem:[#allocation4 + $0x160] sm:$0xff]  ;;  %v124_v20 = vld [vmem:[#allocation4 + $0x170] sm:$0xff] }
  0x2c   :  { %169 = vmatpush1.msra.mxu0 %v130_v11  ;;  %282 = vmatpush1.msra.mxu1 %v132_v12  ;;  %v119_v21 = vld [vmem:[#allocation4 + $0x148] sm:$0xff]  ;;  %v121_v22 = vld [vmem:[#allocation4 + $0x158] sm:$0xff]  ;;  %v118_v23 = vld [vmem:[#allocation4 + $0x140] sm:$0xff] }
  0x2d   :  { %170 = vmatprep.subr.mxu0 %v127_v13  ;;  %283 = vmatprep.subr.mxu1 %v129_v14  ;;  %v120_v24 = vld [vmem:[#allocation4 + $0x150] sm:$0xff]  ;;  %v115_v25 = vld [vmem:[#allocation4 + $0x128] sm:$0xff]  ;;  %v117_v26 = vld [vmem:[#allocation4 + $0x138] sm:$0xff] }
  0x2e   :  { %171 = vmatpush1.msra.mxu0 %v126_v15  ;;  %284 = vmatpush1.msra.mxu1 %v128_v16  ;;  %v114_v27 = vld [vmem:[#allocation4 + $0x120] sm:$0xff]  ;;  %v116_v28 = vld [vmem:[#allocation4 + $0x130] sm:$0xff]  ;;  %v111_v29 = vld [vmem:[#allocation4 + $0x108] sm:$0xff] }
  0x2f   :  { %172 = vmatprep.subr.mxu0 %v123_v17  ;;  %285 = vmatprep.subr.mxu1 %v125_v18  ;;  %v113_v30 = vld [vmem:[#allocation4 + $0x118] sm:$0xff]  ;;  %v110_v31 = vld [vmem:[#allocation4 + $0x100] sm:$0xff]  ;;  %v112_v32 = vld [vmem:[#allocation4 + $0x110] sm:$0xff] }
  0x30   :  { %173 = vmatpush1.msra.mxu0 %v122_v19  ;;  %286 = vmatpush1.msra.mxu1 %v124_v20  ;;  %v107_v33 = vld [vmem:[#allocation4 + $0xe8] sm:$0xff]  ;;  %v109_v34 = vld [vmem:[#allocation4 + $0xf8] sm:$0xff]  ;;  %v106_v35 = vld [vmem:[#allocation4 + $0xe0] sm:$0xff] }
  0x31   :  { %174 = vmatprep.subr.mxu0 %v119_v21  ;;  %287 = vmatprep.subr.mxu1 %v121_v22  ;;  %v108_v36 = vld [vmem:[#allocation4 + $0xf0] sm:$0xff]  ;;  %v103_v37 = vld [vmem:[#allocation4 + $0xc8] sm:$0xff]  ;;  %v105_v38 = vld [vmem:[#allocation4 + $0xd8] sm:$0xff] }
  0x32   :  { %175 = vmatpush1.msra.mxu0 %v118_v23  ;;  %288 = vmatpush1.msra.mxu1 %v120_v24  ;;  %v102_v39 = vld [vmem:[#allocation4 + $0xc0] sm:$0xff]  ;;  %v104_v40 = vld [vmem:[#allocation4 + $0xd0] sm:$0xff]  ;;  %v99_v41 = vld [vmem:[#allocation4 + $0xa8] sm:$0xff] }
  0x33   :  { %176 = vmatprep.subr.mxu0 %v115_v25  ;;  %289 = vmatprep.subr.mxu1 %v117_v26  ;;  %v101_v42 = vld [vmem:[#allocation4 + $0xb8] sm:$0xff]  ;;  %v98_v43 = vld [vmem:[#allocation4 + $0xa0] sm:$0xff]  ;;  %v100_v44 = vld [vmem:[#allocation4 + $0xb0] sm:$0xff] }
  0x34   :  { %177 = vmatpush1.msra.mxu0 %v114_v27  ;;  %290 = vmatpush1.msra.mxu1 %v116_v28  ;;  %v95_v45 = vld [vmem:[#allocation4 + $0x88] sm:$0xff]  ;;  %v97_v46 = vld [vmem:[#allocation4 + $0x98] sm:$0xff]  ;;  %v94_v47 = vld [vmem:[#allocation4 + $0x80] sm:$0xff] }
  0x35   :  { %178 = vmatprep.subr.mxu0 %v111_v29  ;;  %291 = vmatprep.subr.mxu1 %v113_v30  ;;  %v96_v48 = vld [vmem:[#allocation4 + $0x90] sm:$0xff]  ;;  %v91_v49 = vld [vmem:[#allocation4 + $0x68] sm:$0xff]  ;;  %v93_v50 = vld [vmem:[#allocation4 + $0x78] sm:$0xff] }
  0x36   :  { %179 = vmatpush1.msra.mxu0 %v110_v31  ;;  %292 = vmatpush1.msra.mxu1 %v112_v32  ;;  %v90_v51 = vld [vmem:[#allocation4 + $0x60] sm:$0xff]  ;;  %v92_v52 = vld [vmem:[#allocation4 + $0x70] sm:$0xff]  ;;  %v87_v53 = vld [vmem:[#allocation4 + $0x48] sm:$0xff] }
  0x37   :  { %180 = vmatprep.subr.mxu0 %v107_v33  ;;  %293 = vmatprep.subr.mxu1 %v109_v34  ;;  %v89_v54 = vld [vmem:[#allocation4 + $0x58] sm:$0xff]  ;;  %v86_v55 = vld [vmem:[#allocation4 + $0x40] sm:$0xff]  ;;  %v88_v56 = vld [vmem:[#allocation4 + $0x50] sm:$0xff] }
  0x38   :  { %181 = vmatpush1.msra.mxu0 %v106_v35  ;;  %294 = vmatpush1.msra.mxu1 %v108_v36  ;;  %v83_v57 = vld [vmem:[#allocation4 + $0x28] sm:$0xff]  ;;  %v85_v58 = vld [vmem:[#allocation4 + $0x38] sm:$0xff]  ;;  %v82_v59 = vld [vmem:[#allocation4 + $0x20] sm:$0xff] }
  0x39   :  { %182 = vmatprep.subr.mxu0 %v103_v37  ;;  %295 = vmatprep.subr.mxu1 %v105_v38  ;;  %v84_v60 = vld [vmem:[#allocation4 + $0x30] sm:$0xff]  ;;  %v79_v61 = vld [vmem:[#allocation4 + $0x8] sm:$0xff]  ;;  %v81_v62 = vld [vmem:[#allocation4 + $0x18] sm:$0xff] }
  0x3a   :  { %183 = vmatpush1.msra.mxu0 %v102_v39  ;;  %296 = vmatpush1.msra.mxu1 %v104_v40  ;;  %v78_v63 = vld [vmem:[#allocation4] sm:$0xff]  ;;  %v80_v1 = vld [vmem:[#allocation4 + $0x10] sm:$0xff]  ;;  %v2734_v3 = vld [vmem:[#allocation6 + $0x1e8] sm:$0xff] }
  0x3b   :  { %184 = vmatprep.subr.mxu0 %v99_v41  ;;  %297 = vmatprep.subr.mxu1 %v101_v42  ;;  %v70_v2 = vld [vmem:[%s3661_s0] sm:$0xff]  ;;  %v2736_v4 = vld [vmem:[#allocation6 + $0x1f8] sm:$0xff]  ;;  %v2740_v6 = vld [vmem:[#allocation6 + $0x1f0] sm:$0xff] }
  0x3c   :  { %185 = vmatpush1.msra.mxu0 %v98_v43  ;;  %298 = vmatpush1.msra.mxu1 %v100_v44  ;;  %v2738_v5 = vld [vmem:[#allocation6 + $0x1e0] sm:$0xff]  ;;  %v2742_v7 = vld [vmem:[#allocation6 + $0x1c8] sm:$0xff]  ;;  %v2744_v8 = vld [vmem:[#allocation6 + $0x1d8] sm:$0xff] }
  0x3d   :  { %186 = vmatprep.subr.mxu0 %v95_v45  ;;  %299 = vmatprep.subr.mxu1 %v97_v46  ;;  %v2750_v9 = vld [vmem:[#allocation6 + $0x1c0] sm:$0xff]  ;;  %v2752_v10 = vld [vmem:[#allocation6 + $0x1d0] sm:$0xff]  ;;  %v71_v11 = vld [vmem:[%s3661_s0 + $0x8] sm:$0xff] }
  0x3e   :  { %187 = vmatpush1.msra.mxu0 %v94_v47  ;;  %300 = vmatpush1.msra.mxu1 %v96_v48  ;;  %v2761_v12 = vld [vmem:[#allocation6 + $0x1a8] sm:$0xff]  ;;  %v2763_v13 = vld [vmem:[#allocation6 + $0x1b8] sm:$0xff]  ;;  %v2767_v14 = vld [vmem:[#allocation6 + $0x1a0] sm:$0xff] }
  0x3f   :  { %188 = vmatprep.subr.mxu0 %v91_v49  ;;  %301 = vmatprep.subr.mxu1 %v93_v50  ;;  %v2769_v15 = vld [vmem:[#allocation6 + $0x1b0] sm:$0xff]  ;;  %v2771_v16 = vld [vmem:[#allocation6 + $0x188] sm:$0xff]  ;;  %v2773_v17 = vld [vmem:[#allocation6 + $0x198] sm:$0xff] }
  0x40   :  { %189 = vmatpush1.msra.mxu0 %v90_v51  ;;  %302 = vmatpush1.msra.mxu1 %v92_v52  ;;  %v2779_v18 = vld [vmem:[#allocation6 + $0x180] sm:$0xff]  ;;  %v2781_v19 = vld [vmem:[#allocation6 + $0x190] sm:$0xff]  ;;  %v2790_v21 = vld [vmem:[#allocation6 + $0x168] sm:$0xff] }
  0x41   :  { %190 = vmatprep.subr.mxu0 %v87_v53  ;;  %303 = vmatprep.subr.mxu1 %v89_v54  ;;  %v72_v20 = vld [vmem:[%s3661_s0 + $0x10] sm:$0xff]  ;;  %v2792_v22 = vld [vmem:[#allocation6 + $0x178] sm:$0xff]  ;;  %v2796_v23 = vld [vmem:[#allocation6 + $0x160] sm:$0xff] }
  0x42   :  { %191 = vmatpush1.msra.mxu0 %v86_v55  ;;  %304 = vmatpush1.msra.mxu1 %v88_v56  ;;  %v2798_v24 = vld [vmem:[#allocation6 + $0x170] sm:$0xff]  ;;  %v2800_v25 = vld [vmem:[#allocation6 + $0x148] sm:$0xff]  ;;  %v2802_v26 = vld [vmem:[#allocation6 + $0x158] sm:$0xff] }
  0x43   :  { %192 = vmatprep.subr.mxu0 %v83_v57  ;;  %305 = vmatprep.subr.mxu1 %v85_v58  ;;  %v2808_v27 = vld [vmem:[#allocation6 + $0x140] sm:$0xff]  ;;  %v2810_v28 = vld [vmem:[#allocation6 + $0x150] sm:$0xff]  ;;  %v73_v29 = vld [vmem:[%s3661_s0 + $0x18] sm:$0xff] }
  0x44   :  { %193 = vmatpush1.msra.mxu0 %v82_v59  ;;  %306 = vmatpush1.msra.mxu1 %v84_v60  ;;  %v2819_v30 = vld [vmem:[#allocation6 + $0x128] sm:$0xff]  ;;  %v2821_v31 = vld [vmem:[#allocation6 + $0x138] sm:$0xff]  ;;  %v2825_v32 = vld [vmem:[#allocation6 + $0x120] sm:$0xff] }
  0x45   :  { %194 = vmatprep.subr.mxu0 %v79_v61  ;;  %307 = vmatprep.subr.mxu1 %v81_v62  ;;  %v2827_v33 = vld [vmem:[#allocation6 + $0x130] sm:$0xff]  ;;  %v2829_v34 = vld [vmem:[#allocation6 + $0x108] sm:$0xff]  ;;  %v2831_v35 = vld [vmem:[#allocation6 + $0x118] sm:$0xff] }
  0x46   :  { %195 = vmatpush1.msra.mxu0 %v78_v63  ;;  %308 = vmatpush1.msra.mxu1 %v80_v1  ;;  %v2837_v36 = vld [vmem:[#allocation6 + $0x100] sm:$0xff]  ;;  %v2839_v37 = vld [vmem:[#allocation6 + $0x110] sm:$0xff]  ;;  %v2848_v39 = vld [vmem:[#allocation6 + $0xe8] sm:$0xff] }
  0x47   :  { %229 = vmatmul.mubr.f32.vlgmr.msra.gmra.mxu0 %v70_v2  ;;  %342 = vmatmul.mubr.f32.vlgmr.msra.gmra.mxu1 %v70_v2  ;;  %v74_v38 = vld [vmem:[%s3661_s0 + $0x20] sm:$0xff]  ;;  %v2850_v40 = vld [vmem:[#allocation6 + $0xf8] sm:$0xff]  ;;  %v2856_v42 = vld [vmem:[#allocation6 + $0xf0] sm:$0xff] }
  0x48   :  { %455 = vmatprep.subr.mxu0 %v2734_v3  ;;  %526 = vmatprep.subr.mxu1 %v2736_v4  ;;  %v2854_v41 = vld [vmem:[#allocation6 + $0xe0] sm:$0xff]  ;;  %v2858_v43 = vld [vmem:[#allocation6 + $0xc8] sm:$0xff]  ;;  %v2860_v44 = vld [vmem:[#allocation6 + $0xd8] sm:$0xff] }
  0x49   :  { %456 = vmatpush1.msra.mxu0 %v2738_v5  ;;  %527 = vmatpush1.msra.mxu1 %v2740_v6  ;;  %v2866_v45 = vld [vmem:[#allocation6 + $0xc0] sm:$0xff]  ;;  %v2868_v46 = vld [vmem:[#allocation6 + $0xd0] sm:$0xff]  ;;  %v75_v47 = vld [vmem:[%s3661_s0 + $0x28] sm:$0xff] }
  0x4a   :  { %457 = vmatprep.subr.mxu0 %v2742_v7  ;;  %528 = vmatprep.subr.mxu1 %v2744_v8  ;;  %v2877_v48 = vld [vmem:[#allocation6 + $0xa8] sm:$0xff]  ;;  %v2879_v49 = vld [vmem:[#allocation6 + $0xb8] sm:$0xff]  ;;  %v2883_v50 = vld [vmem:[#allocation6 + $0xa0] sm:$0xff] }
  0x4b   :  { %234 = vmatprep.mubr.f32.mxu0 %v3668_v0  ;;  %347 = vmatprep.mubr.f32.mxu1 %v3668_v0  ;;  %v2885_v51 = vld [vmem:[#allocation6 + $0xb0] sm:$0xff]  ;;  %v2887_v52 = vld [vmem:[#allocation6 + $0x88] sm:$0xff]  ;;  %v2889_v53 = vld [vmem:[#allocation6 + $0x98] sm:$0xff] }
  0x4c   :  { %458 = vmatpush1.msra.mxu0 %v2750_v9  ;;  %529 = vmatpush1.msra.mxu1 %v2752_v10  ;;  %3733 = vst [vmem:[#allocation11_spill] sm:$0xff] %v2887_v52  ;;  %3734 = vst [vmem:[#allocation12_spill] sm:$0xff] %v2889_v53  ;;  %v2895_v54 = vld [vmem:[#allocation6 + $0x80] sm:$0xff]  ;;  %v2897_v55 = vld [vmem:[#allocation6 + $0x90] sm:$0xff] }
  0x4d   :  { %235 = vmatmul.mubr.f32.gmra.mxu0 %v71_v11  ;;  %348 = vmatmul.mubr.f32.gmra.mxu1 %v71_v11  ;;  %3735 = vst [vmem:[#allocation13_spill] sm:$0xff] %v2895_v54  ;;  %3736 = vst [vmem:[#allocation14_spill] sm:$0xff] %v2897_v55  ;;  %v76_v56 = vld [vmem:[%s3661_s0 + $0x30] sm:$0xff]  ;;  %v2906_v57 = vld [vmem:[#allocation6 + $0x68] sm:$0xff] }
  0x4e   :  { %459 = vmatprep.subr.mxu0 %v2761_v12  ;;  %530 = vmatprep.subr.mxu1 %v2763_v13  ;;  %3737 = vst [vmem:[#allocation15_spill] sm:$0xff] %v2906_v57  ;;  %v2908_v58 = vld [vmem:[#allocation6 + $0x78] sm:$0xff]  ;;  %v2912_v59 = vld [vmem:[#allocation6 + $0x60] sm:$0xff]  ;;  %v2914_v60 = vld [vmem:[#allocation6 + $0x70] sm:$0xff] }
  0x4f   :  { %460 = vmatpush1.msra.mxu0 %v2767_v14  ;;  %531 = vmatpush1.msra.mxu1 %v2769_v15  ;;  %3738 = vst [vmem:[#allocation16_spill] sm:$0xff] %v2908_v58  ;;  %3739 = vst [vmem:[#allocation17_spill] sm:$0xff] %v2912_v59  ;;  %v2916_v61 = vld [vmem:[#allocation6 + $0x48] sm:$0xff]  ;;  %v2918_v62 = vld [vmem:[#allocation6 + $0x58] sm:$0xff] }
  0x50   :  { %461 = vmatprep.subr.mxu0 %v2771_v16  ;;  %532 = vmatprep.subr.mxu1 %v2773_v17  ;;  %3740 = vst [vmem:[#allocation18_spill] sm:$0xff] %v2914_v60  ;;  %3741 = vst [vmem:[#allocation19_spill] sm:$0xff] %v2916_v61  ;;  %v2924_v63 = vld [vmem:[#allocation6 + $0x40] sm:$0xff]  ;;  %v2926_v1 = vld [vmem:[#allocation6 + $0x50] sm:$0xff] }
  0x51   :  { %240 = vmatprep.mubr.f32.mxu0 %v3668_v0  ;;  %353 = vmatprep.mubr.f32.mxu1 %v3668_v0  ;;  %3742 = vst [vmem:[#allocation20_spill] sm:$0xff] %v2918_v62  ;;  %3743 = vst [vmem:[#allocation21_spill] sm:$0xff] %v2924_v63  ;;  %v77_v2 = vld [vmem:[%s3661_s0 + $0x38] sm:$0xff]  ;;  %v2935_v11 = vld [vmem:[#allocation6 + $0x28] sm:$0xff] }
  0x52   :  { %462 = vmatpush1.msra.mxu0 %v2779_v18  ;;  %533 = vmatpush1.msra.mxu1 %v2781_v19  ;;  %3744 = vst [vmem:[#allocation22_spill] sm:$0xff] %v2926_v1  ;;  %3745 = vst [vmem:[#allocation23_spill] sm:$0xff] %v2935_v11 }
  0x53   :  { %241 = vmatmul.mubr.f32.gmra.mxu0 %v72_v20  ;;  %354 = vmatmul.mubr.f32.gmra.mxu1 %v72_v20  ;;  %v2937_v20 = vld [vmem:[#allocation6 + $0x38] sm:$0xff] }
  0x54   :  { %463 = vmatprep.subr.mxu0 %v2790_v21  ;;  %534 = vmatprep.subr.mxu1 %v2792_v22  ;;  %3746 = vst [vmem:[#allocation24_spill] sm:$0xff] %v2937_v20 }
  0x55   :  { %464 = vmatpush1.msra.mxu0 %v2796_v23  ;;  %535 = vmatpush1.msra.mxu1 %v2798_v24 }
  0x56   :  { %465 = vmatprep.subr.mxu0 %v2800_v25  ;;  %536 = vmatprep.subr.mxu1 %v2802_v26 }
  0x57   :  { %246 = vmatprep.mubr.f32.mxu0 %v3668_v0  ;;  %359 = vmatprep.mubr.f32.mxu1 %v3668_v0 }
  0x58   :  { %466 = vmatpush1.msra.mxu0 %v2808_v27  ;;  %537 = vmatpush1.msra.mxu1 %v2810_v28 }
  0x59   :  { %247 = vmatmul.mubr.f32.gmra.mxu0 %v73_v29  ;;  %360 = vmatmul.mubr.f32.gmra.mxu1 %v73_v29  ;;  %v2941_v29 = vld [vmem:[#allocation6 + $0x20] sm:$0xff] }
  0x5a   :  { %467 = vmatprep.subr.mxu0 %v2819_v30  ;;  %538 = vmatprep.subr.mxu1 %v2821_v31  ;;  %3747 = vst [vmem:[#allocation25_spill] sm:$0xff] %v2941_v29 }
  0x5b   :  { %468 = vmatpush1.msra.mxu0 %v2825_v32  ;;  %539 = vmatpush1.msra.mxu1 %v2827_v33 }
  0x5c   :  { %469 = vmatprep.subr.mxu0 %v2829_v34  ;;  %540 = vmatprep.subr.mxu1 %v2831_v35 }
  0x5d   :  { %252 = vmatprep.mubr.f32.mxu0 %v3668_v0  ;;  %365 = vmatprep.mubr.f32.mxu1 %v3668_v0 }
  0x5e   :  { %470 = vmatpush1.msra.mxu0 %v2837_v36  ;;  %541 = vmatpush1.msra.mxu1 %v2839_v37 }
  0x5f   :  { %253 = vmatmul.mubr.f32.gmra.mxu0 %v74_v38  ;;  %366 = vmatmul.mubr.f32.gmra.mxu1 %v74_v38  ;;  %v2943_v38 = vld [vmem:[#allocation6 + $0x30] sm:$0xff] }
  0x60   :  { %471 = vmatprep.subr.mxu0 %v2848_v39  ;;  %542 = vmatprep.subr.mxu1 %v2850_v40  ;;  %3748 = vst [vmem:[#allocation26_spill] sm:$0xff] %v2943_v38 }
  0x61   :  { %472 = vmatpush1.msra.mxu0 %v2854_v41  ;;  %543 = vmatpush1.msra.mxu1 %v2856_v42 }
  0x62   :  { %473 = vmatprep.subr.mxu0 %v2858_v43  ;;  %544 = vmatprep.subr.mxu1 %v2860_v44 }
  0x63   :  { %258 = vmatprep.mubr.f32.mxu0 %v3668_v0  ;;  %371 = vmatprep.mubr.f32.mxu1 %v3668_v0 }
  0x64   :  { %474 = vmatpush1.msra.mxu0 %v2866_v45  ;;  %545 = vmatpush1.msra.mxu1 %v2868_v46 }
  0x65   :  { %259 = vmatmul.mubr.f32.gmra.mxu0 %v75_v47  ;;  %372 = vmatmul.mubr.f32.gmra.mxu1 %v75_v47  ;;  %v2945_v47 = vld [vmem:[#allocation6 + $0x8] sm:$0xff] }
  0x66   :  { %475 = vmatprep.subr.mxu0 %v2877_v48  ;;  %546 = vmatprep.subr.mxu1 %v2879_v49  ;;  %3749 = vst [vmem:[#allocation27_spill] sm:$0xff] %v2945_v47 }
  0x67   :  { %476 = vmatpush1.msra.mxu0 %v2883_v50  ;;  %547 = vmatpush1.msra.mxu1 %v2885_v51 }
  0x68   :  { %477 = vmatprep.subr.mxu0 %v2887_v52  ;;  %548 = vmatprep.subr.mxu1 %v2889_v53 }
  0x69   :  { %264 = vmatprep.mubr.f32.mxu0 %v3668_v0  ;;  %377 = vmatprep.mubr.f32.mxu1 %v3668_v0 }
  0x6a   :  { %478 = vmatpush1.msra.mxu0 %v2895_v54  ;;  %549 = vmatpush1.msra.mxu1 %v2897_v55 }
  0x6b   :  { %265 = vmatmul.mubr.f32.gmra.mxu0 %v76_v56  ;;  %378 = vmatmul.mubr.f32.gmra.mxu1 %v76_v56  ;;  %v2947_v56 = vld [vmem:[#allocation6 + $0x18] sm:$0xff] }
  0x6c   :  { %479 = vmatprep.subr.mxu0 %v2906_v57  ;;  %550 = vmatprep.subr.mxu1 %v2908_v58  ;;  %3750 = vst [vmem:[#allocation28_spill] sm:$0xff] %v2947_v56 }
  0x6d   :  { %480 = vmatpush1.msra.mxu0 %v2912_v59  ;;  %551 = vmatpush1.msra.mxu1 %v2914_v60 }
  0x6e   :  { %481 = vmatprep.subr.mxu0 %v2916_v61  ;;  %552 = vmatprep.subr.mxu1 %v2918_v62 }
  0x6f   :  { %270 = vmatprep.mubr.f32.mxu0 %v3668_v0  ;;  %383 = vmatprep.mubr.f32.mxu1 %v3668_v0  ;;  %v2951_v0 = vld [vmem:[#allocation6] sm:$0xff] }
  0x70   :  { %482 = vmatpush1.msra.mxu0 %v2924_v63  ;;  %553 = vmatpush1.msra.mxu1 %v2926_v1  ;;  %3751 = vst [vmem:[#allocation29_spill] sm:$0xff] %v2951_v0  ;;  %v2955_v1 = vld [vmem:[#allocation6 + $0x10] sm:$0xff] }
  0x71   :  { %271 = vmatmul.mubr.f32.gmra.mxu0 %v77_v2  ;;  %384 = vmatmul.mubr.f32.gmra.mxu1 %v77_v2  ;;  %3752 = vst [vmem:[#allocation30_spill] sm:$0xff] %v2955_v1  ;;  %v3753_v2 = vmov 0.0  }
  0x72   :  { %483 = vmatprep.subr.mxu0 %v2935_v11  ;;  %554 = vmatprep.subr.mxu1 %v2937_v20 }
  0x73   :  { %484 = vmatpush1.msra.mxu0 %v2941_v29  ;;  %555 = vmatpush1.msra.mxu1 %v2943_v38 }
  0x74   :  { %485 = vmatprep.subr.mxu0 %v2945_v47  ;;  %556 = vmatprep.subr.mxu1 %v2947_v56 }
  0x75   :  { %486 = vmatpush1.msra.mxu0 %v2951_v0  ;;  %519 = vmatprep.mubr.f32.mxu0 %v3753_v2 }
  0x76   :  { %557 = vmatpush1.msra.mxu1 %v2955_v1  ;;  %590 = vmatprep.mubr.f32.mxu1 %v3753_v2 }
  0x77   :  { %520 = vmatmul.mubr.f32.vlgmr.msra.gmra.mxu0 %v3753_v2  ;;  %591 = vmatmul.mubr.f32.vlgmr.msra.gmra.mxu1 %v3753_v2 }
  0x78   :  { %693 = vmatprep.subr.mxu0 %v2734_v3  ;;  %764 = vmatprep.subr.mxu1 %v2736_v4 }
  0x79   :  { %694 = vmatpush1.msra.mxu0 %v2738_v5  ;;  %765 = vmatpush1.msra.mxu1 %v2740_v6 }
  0x7a   :  { %695 = vmatprep.subr.mxu0 %v2742_v7  ;;  %766 = vmatprep.subr.mxu1 %v2744_v8 }
  0x7b   :  { %696 = vmatpush1.msra.mxu0 %v2750_v9  ;;  %767 = vmatpush1.msra.mxu1 %v2752_v10 }
  0x7c   :  { %697 = vmatprep.subr.mxu0 %v2761_v12  ;;  %768 = vmatprep.subr.mxu1 %v2763_v13 }
  0x7d   :  { %698 = vmatpush1.msra.mxu0 %v2767_v14  ;;  %769 = vmatpush1.msra.mxu1 %v2769_v15 }
  0x7e   :  { %699 = vmatprep.subr.mxu0 %v2771_v16  ;;  %770 = vmatprep.subr.mxu1 %v2773_v17 }
  0x7f   :  { %700 = vmatpush1.msra.mxu0 %v2779_v18  ;;  %771 = vmatpush1.msra.mxu1 %v2781_v19 }
  0x80   :  { %701 = vmatprep.subr.mxu0 %v2790_v21  ;;  %772 = vmatprep.subr.mxu1 %v2792_v22 }
  0x81   :  { %702 = vmatpush1.msra.mxu0 %v2796_v23  ;;  %773 = vmatpush1.msra.mxu1 %v2798_v24 }
  0x82   :  { %703 = vmatprep.subr.mxu0 %v2800_v25  ;;  %774 = vmatprep.subr.mxu1 %v2802_v26 }
  0x83   :  { %704 = vmatpush1.msra.mxu0 %v2808_v27  ;;  %775 = vmatpush1.msra.mxu1 %v2810_v28 }
  0x84   :  { %705 = vmatprep.subr.mxu0 %v2819_v30  ;;  %776 = vmatprep.subr.mxu1 %v2821_v31 }
  0x85   :  { %706 = vmatpush1.msra.mxu0 %v2825_v32  ;;  %777 = vmatpush1.msra.mxu1 %v2827_v33 }
  0x86   :  { %707 = vmatprep.subr.mxu0 %v2829_v34  ;;  %778 = vmatprep.subr.mxu1 %v2831_v35 }
  0x87   :  { %708 = vmatpush1.msra.mxu0 %v2837_v36  ;;  %779 = vmatpush1.msra.mxu1 %v2839_v37 }
  0x88   :  { %709 = vmatprep.subr.mxu0 %v2848_v39  ;;  %780 = vmatprep.subr.mxu1 %v2850_v40 }
  0x89   :  { %710 = vmatpush1.msra.mxu0 %v2854_v41  ;;  %781 = vmatpush1.msra.mxu1 %v2856_v42 }
  0x8a   :  { %711 = vmatprep.subr.mxu0 %v2858_v43  ;;  %782 = vmatprep.subr.mxu1 %v2860_v44 }
  0x8b   :  { %712 = vmatpush1.msra.mxu0 %v2866_v45  ;;  %783 = vmatpush1.msra.mxu1 %v2868_v46 }
  0x8c   :  { %713 = vmatprep.subr.mxu0 %v2877_v48  ;;  %784 = vmatprep.subr.mxu1 %v2879_v49 }
  0x8d   :  { %714 = vmatpush1.msra.mxu0 %v2883_v50  ;;  %785 = vmatpush1.msra.mxu1 %v2885_v51 }
  0x8e   :  { %715 = vmatprep.subr.mxu0 %v2887_v52  ;;  %786 = vmatprep.subr.mxu1 %v2889_v53  ;;  %v3754_v52 = vld [vmem:[#allocation22_spill] sm:$0xff] }
  0x8f   :  { %716 = vmatpush1.msra.mxu0 %v2895_v54  ;;  %787 = vmatpush1.msra.mxu1 %v2897_v55 }
  0x90   :  { %717 = vmatprep.subr.mxu0 %v2906_v57  ;;  %788 = vmatprep.subr.mxu1 %v2908_v58 }
  0x91   :  { %718 = vmatpush1.msra.mxu0 %v2912_v59  ;;  %789 = vmatpush1.msra.mxu1 %v2914_v60 }
  0x92   :  { %719 = vmatprep.subr.mxu0 %v2916_v61  ;;  %790 = vmatprep.subr.mxu1 %v2918_v62 }
  0x93   :  { %720 = vmatpush1.msra.mxu0 %v2924_v63  ;;  %791 = vmatpush1.msra.mxu1 %v3754_v52 }
  0x94   :  { %721 = vmatprep.subr.mxu0 %v2935_v11  ;;  %792 = vmatprep.subr.mxu1 %v2937_v20  ;;  %v144_v20 = vlaneseq }
  0x95   :  { %722 = vmatpush1.msra.mxu0 %v2941_v29  ;;  %793 = vmatpush1.msra.mxu1 %v2943_v38 }
  0x96   :  { %723 = vmatprep.subr.mxu0 %v2945_v47  ;;  %794 = vmatprep.subr.mxu1 %v2947_v56  ;;  %v145_v29 = vshrl.u32 %v144_v20, 7 }
  0x97   :  { %724 = vmatpush1.msra.mxu0 %v2951_v0  ;;  %757 = vmatprep.mubr.f32.mxu0 %v3753_v2  ;;  %v142_v0 = vld [vmem:[%s3664_s3] sm:$0xf] }
  0x98   :  { %795 = vmatpush1.msra.mxu1 %v2955_v1  ;;  %828 = vmatprep.mubr.f32.mxu1 %v3753_v2  ;;  %v146_v47 = vsub.s32 0, %v145_v29  ;;  %v154_v56 = vsub.s32 2, %v145_v29  ;;  %v150_v2 = vsub.s32 1, %v145_v29 }
  0x99   :  { %931 = vmatprep.subr.mxu0 %v2734_v3  ;;  %1002 = vmatprep.subr.mxu1 %v2736_v4  ;;  %v158_v3 = vsub.s32 3, %v145_v29 }
  0x9a   :  { %v147_v63 = vrot.slane %v142_v0, %v146_v47  ;;  %v3044_v4 = vrot.slane %v142_v0, %v154_v56  ;;  %v151_v61 = vrot.slane %v142_v0, %v150_v2 }
  0x9b   :  { %v3046_v60 = vrot.slane %v142_v0, %v158_v3 }
 0x107   :  { %v3033_v11 = vpop.f32.mrf.mxu0  ;;  %v3035_v38 = vpop.f32.mrf.mxu1 }
 0x109   :  { %v3040_v52 = vpop.f32.mrf.mxu0  ;;  %v3042_v1 = vpop.f32.mrf.mxu1 }
 0x10d   :  { %v236_v20 = vpop.f32.mrf.mxu0  ;;  %v349_v62 = vpop.f32.mrf.mxu1 }
 0x10e   :  { %v3048_v59 = vadd.f32 %v236_v20, %v147_v63  ;;  %v3051_v58 = vadd.f32 %v349_v62, %v3044_v4 }
 0x10f   :  { %v238_v57 = vpop.f32.mrf.mxu0  ;;  %v351_v55 = vpop.f32.mrf.mxu1 }
 0x110   :  { %3755 = vst [vmem:[#allocation31_spill] sm:$0xff] %v3048_v59  ;;  %3756 = vst [vmem:[#allocation32_spill] sm:$0xff] %v3051_v58  ;;  %v3053_v54 = vadd.f32 %v238_v57, %v151_v61  ;;  %v3056_v53 = vadd.f32 %v351_v55, %v3046_v60 }
 0x112   :  { %3757 = vst [vmem:[#allocation33_spill] sm:$0xff] %v3053_v54  ;;  %3758 = vst [vmem:[#allocation34_spill] sm:$0xff] %v3056_v53 }
 0x113   :  { %v242_v29 = vpop.f32.mrf.mxu0  ;;  %v355_v47 = vpop.f32.mrf.mxu1 }
 0x114   :  { %v3058_v56 = vadd.f32 %v242_v29, %v147_v63  ;;  %v3061_v2 = vadd.f32 %v355_v47, %v3044_v4 }
 0x115   :  { %v244_v0 = vpop.f32.mrf.mxu0  ;;  %v357_v3 = vpop.f32.mrf.mxu1 }
 0x116   :  { %3759 = vst [vmem:[#allocation35_spill] sm:$0xff] %v3058_v56  ;;  %3760 = vst [vmem:[#allocation36_spill] sm:$0xff] %v3061_v2  ;;  %v3063_v20 = vadd.f32 %v244_v0, %v151_v61  ;;  %v3066_v62 = vadd.f32 %v357_v3, %v3046_v60 }
 0x118   :  { %3761 = vst [vmem:[#allocation37_spill] sm:$0xff] %v3063_v20  ;;  %3762 = vst [vmem:[#allocation38_spill] sm:$0xff] %v3066_v62 }
 0x119   :  { %v248_v58 = vpop.f32.mrf.mxu0  ;;  %v361_v57 = vpop.f32.mrf.mxu1 }
 0x11a   :  { %v3068_v54 = vadd.f32 %v248_v58, %v147_v63  ;;  %v3071_v55 = vadd.f32 %v361_v57, %v3044_v4 }
 0x11b   :  { %v250_v53 = vpop.f32.mrf.mxu0  ;;  %v363_v29 = vpop.f32.mrf.mxu1 }
 0x11c   :  { %3763 = vst [vmem:[#allocation39_spill] sm:$0xff] %v3068_v54  ;;  %3764 = vst [vmem:[#allocation40_spill] sm:$0xff] %v3071_v55  ;;  %v3073_v56 = vadd.f32 %v250_v53, %v151_v61  ;;  %v3076_v47 = vadd.f32 %v363_v29, %v3046_v60 }
 0x11e   :  { %3765 = vst [vmem:[#allocation41_spill] sm:$0xff] %v3073_v56  ;;  %3766 = vst [vmem:[#allocation42_spill] sm:$0xff] %v3076_v47 }
 0x11f   :  { %v254_v2 = vpop.f32.mrf.mxu0  ;;  %v367_v0 = vpop.f32.mrf.mxu1 }
 0x120   :  { %v3078_v20 = vadd.f32 %v254_v2, %v147_v63  ;;  %v3081_v3 = vadd.f32 %v367_v0, %v3044_v4 }
 0x121   :  { %v256_v62 = vpop.f32.mrf.mxu0  ;;  %v369_v58 = vpop.f32.mrf.mxu1 }
 0x122   :  { %3767 = vst [vmem:[#allocation43_spill] sm:$0xff] %v3078_v20  ;;  %3768 = vst [vmem:[#allocation44_spill] sm:$0xff] %v3081_v3  ;;  %v3083_v54 = vadd.f32 %v256_v62, %v151_v61  ;;  %v3086_v57 = vadd.f32 %v369_v58, %v3046_v60 }
 0x124   :  { %3769 = vst [vmem:[#allocation45_spill] sm:$0xff] %v3083_v54  ;;  %3770 = vst [vmem:[#allocation46_spill] sm:$0xff] %v3086_v57 }
 0x125   :  { %v260_v55 = vpop.f32.mrf.mxu0  ;;  %v373_v53 = vpop.f32.mrf.mxu1 }
 0x126   :  { %v3088_v56 = vadd.f32 %v260_v55, %v147_v63  ;;  %v3091_v29 = vadd.f32 %v373_v53, %v3044_v4 }
 0x127   :  { %v262_v47 = vpop.f32.mrf.mxu0  ;;  %v375_v2 = vpop.f32.mrf.mxu1 }
 0x128   :  { %3771 = vst [vmem:[#allocation47_spill] sm:$0xff] %v3088_v56  ;;  %3772 = vst [vmem:[#allocation48_spill] sm:$0xff] %v3091_v29  ;;  %v3093_v20 = vadd.f32 %v262_v47, %v151_v61  ;;  %v3096_v0 = vadd.f32 %v375_v2, %v3046_v60 }
 0x12a   :  { %3773 = vst [vmem:[#allocation49_spill] sm:$0xff] %v3093_v20  ;;  %3774 = vst [vmem:[#allocation50_spill] sm:$0xff] %v3096_v0 }
 0x12b   :  { %v266_v3 = vpop.f32.mrf.mxu0  ;;  %v379_v62 = vpop.f32.mrf.mxu1 }
 0x12c   :  { %v3098_v54 = vadd.f32 %v266_v3, %v147_v63  ;;  %v3101_v58 = vadd.f32 %v379_v62, %v3044_v4 }
 0x12d   :  { %v268_v57 = vpop.f32.mrf.mxu0  ;;  %v381_v55 = vpop.f32.mrf.mxu1 }
 0x12e   :  { %3775 = vst [vmem:[#allocation51_spill] sm:$0xff] %v3098_v54  ;;  %3776 = vst [vmem:[#allocation52_spill] sm:$0xff] %v3101_v58  ;;  %v3103_v56 = vadd.f32 %v268_v57, %v151_v61  ;;  %v3106_v53 = vadd.f32 %v381_v55, %v3046_v60  ;;  %v231_v57 = vadd.f32 %v3033_v11, %v147_v63 }
 0x12f   :  { %v233_v55 = vadd.f32 %v3040_v52, %v151_v61 }
 0x130   :  { %3777 = vst [vmem:[#allocation53_spill] sm:$0xff] %v3103_v56  ;;  %3778 = vst [vmem:[#allocation54_spill] sm:$0xff] %v3106_v53 }
 0x131   :  { %v272_v29 = vpop.f32.mrf.mxu0  ;;  %v385_v47 = vpop.f32.mrf.mxu1 }
 0x132   :  { %v3108_v20 = vadd.f32 %v272_v29, %v147_v63  ;;  %v3111_v2 = vadd.f32 %v385_v47, %v3044_v4 }
 0x133   :  { %v274_v0 = vpop.f32.mrf.mxu0  ;;  %v387_v3 = vpop.f32.mrf.mxu1 }
 0x134   :  { %3779 = vst [vmem:[#allocation55_spill] sm:$0xff] %v3108_v20  ;;  %3780 = vst [vmem:[#allocation56_spill] sm:$0xff] %v3111_v2  ;;  %v3113_v54 = vadd.f32 %v274_v0, %v151_v61  ;;  %v3116_v62 = vadd.f32 %v387_v3, %v3046_v60  ;;  %v346_v0 = vadd.f32 %v3042_v1, %v3046_v60 }
 0x135   :  { %v344_v3 = vadd.f32 %v3035_v38, %v3044_v4 }
 0x136   :  { %3781 = vst [vmem:[#allocation57_spill] sm:$0xff] %v3113_v54  ;;  %3782 = vst [vmem:[#allocation58_spill] sm:$0xff] %v3116_v62 }
 0x137   :  { %v521_v58 = vpop.f32.mrf.mxu0  ;;  %v592_v20 = vpop.f32.mrf.mxu1 }
 0x138   :  { %v597_v53 = vadd.f32 %v521_v58, %v231_v57  ;;  %v599_v62 = vadd.f32 %v592_v20, %v344_v3 }
 0x139   :  { %v523_v56 = vpop.f32.mrf.mxu0  ;;  %v594_v2 = vpop.f32.mrf.mxu1 }
 0x13a   :  { %v2398_v59 = vmul.f32 -1.442695, %v597_v53  ;;  %v598_v29 = vadd.f32 %v523_v56, %v233_v55  ;;  %v600_v54 = vadd.f32 %v594_v2, %v346_v0 }
 0x13c   :  { %2484 = vpow2.f32 %v2398_v59  ;;  %v2399_v47 = vmul.f32 -1.442695, %v598_v29  ;;  %v2400_v63 = vmul.f32 -1.442695, %v600_v54 }
 0x13e   :  { %2486 = vpow2.f32 %v2399_v47 }
 0x13f   :  { %2488 = vpow2.f32 %v2400_v63 }
 0x149   :  { %v2485_v11 = vpop.eup %2484 }
 0x14a   :  { %v604_v52 = vadd.f32 1.0, %v2485_v11 }
 0x14b   :  { %v2487_v61 = vpop.eup %2486 }
 0x14c   :  { %2490 = vrcp.f32 %v604_v52  ;;  %v610_v56 = vadd.f32 1.0, %v2487_v61  ;;  %v2489_v59 = vpop.eup %2488  ;;  %v3201_v61 = vld [vmem:[#allocation6 + $0x1e8] sm:$0xff] }
 0x14d   :  { %2492 = vtanh.f32 %v599_v62  ;;  %v617_v55 = vadd.f32 1.0, %v2489_v59  ;;  %v3207_v59 = vld [vmem:[#allocation6 + $0x1e0] sm:$0xff] }
 0x14e   :  { %2494 = vrcp.f32 %v610_v56  ;;  %v3203_v56 = vld [vmem:[#allocation6 + $0x1f8] sm:$0xff] }
 0x14f   :  { %2496 = vrcp.f32 %v617_v55  ;;  %v3219_v55 = vld [vmem:[#allocation6 + $0x1c0] sm:$0xff] }
 0x159   :  { %v2491_v58 = vpop.eup %2490 }
 0x15a   :  { %v2493_v53 = vpop.eup %2492 }
 0x15b   :  { %v2495_v57 = vpop.eup %2494  ;;  %v622_v1 = vmul.f32 %v2493_v53, %v2491_v58  ;;  %v3209_v58 = vld [vmem:[#allocation6 + $0x1f0] sm:$0xff]  ;;  %v3213_v53 = vld [vmem:[#allocation6 + $0x1c8] sm:$0xff] }
 0x15c   :  { %v621_v60 = vmul.f32 0.0, %v2495_v57  ;;  %v2497_v54 = vpop.eup %2496  ;;  %v3215_v57 = vld [vmem:[#allocation6 + $0x1d8] sm:$0xff] }
 0x15e   :  { %v3124_v2 = vadd.f32 %v622_v1, %v621_v60  ;;  %v3221_v60 = vld [vmem:[#allocation6 + $0x1d0] sm:$0xff]  ;;  %v3225_v1 = vld [vmem:[#allocation6 + $0x1a8] sm:$0xff] }
 0x160   :  { %2498 = vtanh.f32 %v3124_v2 }
 0x16d   :  { %v2499_v38 = vpop.eup %2498 }
 0x16e   :  { %v625_v4 = vmul.f32 %v2499_v38, %v2497_v54  ;;  %v3231_v54 = vld [vmem:[#allocation6 + $0x1a0] sm:$0xff]  ;;  %v3233_v38 = vld [vmem:[#allocation6 + $0x1b0] sm:$0xff] }
 0x170   :  { %758 = vmatmul.mubr.f32.vlgmr.msra.gmra.mxu0 %v625_v4  ;;  %829 = vmatmul.mubr.f32.vlgmr.msra.gmra.mxu1 %v625_v4  ;;  %v3237_v4 = vld [vmem:[#allocation6 + $0x188] sm:$0xff] }
 0x171   :  { %932 = vmatpush1.msra.mxu0 %v2738_v5  ;;  %1003 = vmatpush1.msra.mxu1 %v2740_v6  ;;  %v3783_v5 = vld [vmem:[#allocation11_spill] sm:$0xff]  ;;  %v3784_v6 = vld [vmem:[#allocation12_spill] sm:$0xff] }
 0x172   :  { %933 = vmatprep.subr.mxu0 %v2742_v7  ;;  %1004 = vmatprep.subr.mxu1 %v2744_v8  ;;  %v3785_v7 = vld [vmem:[#allocation13_spill] sm:$0xff]  ;;  %v3786_v8 = vld [vmem:[#allocation14_spill] sm:$0xff]  ;;  %3808 = vst [vmem:[#allocation11_spill] sm:$0xff] %v3201_v61  ;;  %3809 = vst [vmem:[#allocation12_spill] sm:$0xff] %v3203_v56 }
 0x173   :  { %934 = vmatpush1.msra.mxu0 %v2750_v9  ;;  %1005 = vmatpush1.msra.mxu1 %v2752_v10  ;;  %v3787_v9 = vld [vmem:[#allocation15_spill] sm:$0xff]  ;;  %v3788_v10 = vld [vmem:[#allocation16_spill] sm:$0xff] }
 0x174   :  { %935 = vmatprep.subr.mxu0 %v2761_v12  ;;  %1006 = vmatprep.subr.mxu1 %v2763_v13  ;;  %v3789_v12 = vld [vmem:[#allocation17_spill] sm:$0xff]  ;;  %v3790_v13 = vld [vmem:[#allocation18_spill] sm:$0xff] }
 0x175   :  { %936 = vmatpush1.msra.mxu0 %v2767_v14  ;;  %1007 = vmatpush1.msra.mxu1 %v2769_v15  ;;  %v3791_v14 = vld [vmem:[#allocation19_spill] sm:$0xff]  ;;  %v3792_v15 = vld [vmem:[#allocation20_spill] sm:$0xff] }
 0x176   :  { %937 = vmatprep.subr.mxu0 %v2771_v16  ;;  %1008 = vmatprep.subr.mxu1 %v2773_v17  ;;  %v3793_v16 = vld [vmem:[#allocation21_spill] sm:$0xff]  ;;  %v3794_v17 = vld [vmem:[#allocation22_spill] sm:$0xff] }
 0x177   :  { %938 = vmatpush1.msra.mxu0 %v2779_v18  ;;  %1009 = vmatpush1.msra.mxu1 %v2781_v19  ;;  %v3795_v18 = vld [vmem:[#allocation23_spill] sm:$0xff]  ;;  %v3796_v19 = vld [vmem:[#allocation24_spill] sm:$0xff] }
 0x178   :  { %939 = vmatprep.subr.mxu0 %v2790_v21  ;;  %1010 = vmatprep.subr.mxu1 %v2792_v22  ;;  %v3797_v21 = vld [vmem:[#allocation25_spill] sm:$0xff]  ;;  %v3798_v22 = vld [vmem:[#allocation26_spill] sm:$0xff] }
 0x179   :  { %940 = vmatpush1.msra.mxu0 %v2796_v23  ;;  %1011 = vmatpush1.msra.mxu1 %v2798_v24  ;;  %v3799_v23 = vld [vmem:[#allocation27_spill] sm:$0xff]  ;;  %v3800_v24 = vld [vmem:[#allocation28_spill] sm:$0xff] }
 0x17a   :  { %941 = vmatprep.subr.mxu0 %v2800_v25  ;;  %1012 = vmatprep.subr.mxu1 %v2802_v26  ;;  %v3801_v25 = vld [vmem:[#allocation29_spill] sm:$0xff]  ;;  %v3802_v26 = vmov 0.0  }
 0x17b   :  { %942 = vmatpush1.msra.mxu0 %v2808_v27  ;;  %1013 = vmatpush1.msra.mxu1 %v2810_v28  ;;  %v3803_v27 = vld [vmem:[#allocation30_spill] sm:$0xff] }
 0x17c   :  { %943 = vmatprep.subr.mxu0 %v2819_v30  ;;  %1014 = vmatprep.subr.mxu1 %v2821_v31  ;;  %v3804_v30 = vld [vmem:[#allocation31_spill] sm:$0xff] }
 0x17d   :  { %944 = vmatpush1.msra.mxu0 %v2825_v32  ;;  %1015 = vmatpush1.msra.mxu1 %v2827_v33 }
 0x17e   :  { %945 = vmatprep.subr.mxu0 %v2829_v34  ;;  %1016 = vmatprep.subr.mxu1 %v2831_v35  ;;  %v3805_v34 = vld [vmem:[#allocation33_spill] sm:$0xff] }
 0x17f   :  { %946 = vmatpush1.msra.mxu0 %v2837_v36  ;;  %1017 = vmatpush1.msra.mxu1 %v2839_v37 }
 0x180   :  { %947 = vmatprep.subr.mxu0 %v2848_v39  ;;  %1018 = vmatprep.subr.mxu1 %v2850_v40  ;;  %v3806_v40 = vld [vmem:[#allocation34_spill] sm:$0xff] }
 0x181   :  { %948 = vmatpush1.msra.mxu0 %v2854_v41  ;;  %1019 = vmatpush1.msra.mxu1 %v2856_v42  ;;  %v3807_v42 = vld [vmem:[#allocation32_spill] sm:$0xff] }
 0x182   :  { %949 = vmatprep.subr.mxu0 %v2858_v43  ;;  %1020 = vmatprep.subr.mxu1 %v2860_v44 }
 0x183   :  { %950 = vmatpush1.msra.mxu0 %v2866_v45  ;;  %1021 = vmatpush1.msra.mxu1 %v2868_v46 }
 0x184   :  { %951 = vmatprep.subr.mxu0 %v2877_v48  ;;  %1022 = vmatprep.subr.mxu1 %v2879_v49 }
 0x185   :  { %952 = vmatpush1.msra.mxu0 %v2883_v50  ;;  %1023 = vmatpush1.msra.mxu1 %v2885_v51 }
 0x186   :  { %953 = vmatprep.subr.mxu0 %v3783_v5  ;;  %1024 = vmatprep.subr.mxu1 %v3784_v6  ;;  %v3239_v5 = vld [vmem:[#allocation6 + $0x198] sm:$0xff]  ;;  %v3243_v6 = vld [vmem:[#allocation6 + $0x180] sm:$0xff] }
 0x187   :  { %954 = vmatpush1.msra.mxu0 %v3785_v7  ;;  %1025 = vmatpush1.msra.mxu1 %v3786_v8  ;;  %v3245_v7 = vld [vmem:[#allocation6 + $0x190] sm:$0xff]  ;;  %v3249_v8 = vld [vmem:[#allocation6 + $0x168] sm:$0xff] }
 0x188   :  { %955 = vmatprep.subr.mxu0 %v3787_v9  ;;  %1026 = vmatprep.subr.mxu1 %v3788_v10  ;;  %v3251_v9 = vld [vmem:[#allocation6 + $0x178] sm:$0xff]  ;;  %v3255_v10 = vld [vmem:[#allocation6 + $0x160] sm:$0xff] }
 0x189   :  { %956 = vmatpush1.msra.mxu0 %v3789_v12  ;;  %1027 = vmatpush1.msra.mxu1 %v3790_v13  ;;  %v3257_v12 = vld [vmem:[#allocation6 + $0x170] sm:$0xff]  ;;  %v3261_v13 = vld [vmem:[#allocation6 + $0x148] sm:$0xff] }
 0x18a   :  { %957 = vmatprep.subr.mxu0 %v3791_v14  ;;  %1028 = vmatprep.subr.mxu1 %v3792_v15  ;;  %v3263_v14 = vld [vmem:[#allocation6 + $0x158] sm:$0xff]  ;;  %v3267_v15 = vld [vmem:[#allocation6 + $0x140] sm:$0xff] }
 0x18b   :  { %958 = vmatpush1.msra.mxu0 %v3793_v16  ;;  %1029 = vmatpush1.msra.mxu1 %v3794_v17  ;;  %v3269_v16 = vld [vmem:[#allocation6 + $0x150] sm:$0xff]  ;;  %v3273_v17 = vld [vmem:[#allocation6 + $0x128] sm:$0xff] }
 0x18c   :  { %959 = vmatprep.subr.mxu0 %v3795_v18  ;;  %1030 = vmatprep.subr.mxu1 %v3796_v19  ;;  %v3275_v18 = vld [vmem:[#allocation6 + $0x138] sm:$0xff]  ;;  %v3279_v19 = vld [vmem:[#allocation6 + $0x120] sm:$0xff] }
 0x18d   :  { %960 = vmatpush1.msra.mxu0 %v3797_v21  ;;  %1031 = vmatpush1.msra.mxu1 %v3798_v22  ;;  %v3281_v21 = vld [vmem:[#allocation6 + $0x130] sm:$0xff]  ;;  %v3285_v22 = vld [vmem:[#allocation6 + $0x108] sm:$0xff] }
 0x18e   :  { %961 = vmatprep.subr.mxu0 %v3799_v23  ;;  %1032 = vmatprep.subr.mxu1 %v3800_v24  ;;  %v3287_v23 = vld [vmem:[#allocation6 + $0x118] sm:$0xff]  ;;  %v3289_v24 = vld [vmem:[#allocation6 + $0x100] sm:$0xff] }
 0x18f   :  { %962 = vmatpush1.msra.mxu0 %v3801_v25  ;;  %995 = vmatprep.mubr.f32.mxu0 %v3802_v26  ;;  %v3293_v25 = vld [vmem:[#allocation6 + $0x110] sm:$0xff] }
 0x190   :  { %1033 = vmatpush1.msra.mxu1 %v3803_v27  ;;  %1066 = vmatprep.mubr.f32.mxu1 %v3802_v26  ;;  %v3295_v27 = vld [vmem:[#allocation6 + $0xe8] sm:$0xff] }
 0x191   :  { %1169 = vmatprep.subr.mxu0 %v3201_v61  ;;  %1240 = vmatprep.subr.mxu1 %v3203_v56 }
 0x230   :  { %v759_v28 = vpop.f32.mrf.mxu0  ;;  %v830_v36 = vpop.f32.mrf.mxu1 }
 0x231   :  { %v835_v31 = vadd.f32 %v759_v28, %v3804_v30  ;;  %v837_v43 = vadd.f32 %v830_v36, %v3807_v42  ;;  %v3297_v28 = vld [vmem:[#allocation6 + $0xf8] sm:$0xff]  ;;  %v3301_v30 = vld [vmem:[#allocation6 + $0xe0] sm:$0xff]  ;;  %v3317_v36 = vld [vmem:[#allocation6 + $0xa8] sm:$0xff] }
 0x232   :  { %v761_v32 = vpop.f32.mrf.mxu0  ;;  %v832_v39 = vpop.f32.mrf.mxu1  ;;  %v3331_v42 = vld [vmem:[#allocation6 + $0x98] sm:$0xff] }
 0x233   :  { %v2401_v33 = vmul.f32 -1.442695, %v835_v31  ;;  %v836_v35 = vadd.f32 %v761_v32, %v3805_v34  ;;  %v838_v41 = vadd.f32 %v832_v39, %v3806_v40  ;;  %v3303_v31 = vld [vmem:[#allocation6 + $0xf0] sm:$0xff]  ;;  %v3305_v32 = vld [vmem:[#allocation6 + $0xc8] sm:$0xff]  ;;  %v3311_v34 = vld [vmem:[#allocation6 + $0xc0] sm:$0xff] }
 0x234   :  { %v3323_v39 = vld [vmem:[#allocation6 + $0xa0] sm:$0xff]  ;;  %v3325_v40 = vld [vmem:[#allocation6 + $0xb0] sm:$0xff] }
 0x235   :  { %2500 = vpow2.f32 %v2401_v33  ;;  %v2402_v37 = vmul.f32 -1.442695, %v836_v35  ;;  %v2403_v44 = vmul.f32 -1.442695, %v838_v41  ;;  %v3309_v33 = vld [vmem:[#allocation6 + $0xd8] sm:$0xff]  ;;  %v3313_v35 = vld [vmem:[#allocation6 + $0xd0] sm:$0xff] }
 0x236   :  { %v3329_v41 = vld [vmem:[#allocation6 + $0x88] sm:$0xff] }
 0x237   :  { %2502 = vpow2.f32 %v2402_v37  ;;  %v3319_v37 = vld [vmem:[#allocation6 + $0xb8] sm:$0xff] }
 0x238   :  { %2504 = vtanh.f32 %v837_v43  ;;  %v3335_v43 = vld [vmem:[#allocation6 + $0x80] sm:$0xff] }
 0x239   :  { %2506 = vpow2.f32 %v2403_v44  ;;  %v3337_v44 = vld [vmem:[#allocation6 + $0x90] sm:$0xff] }
 0x23a   :  { %3810 = vst [vmem:[#allocation13_spill] sm:$0xff] %v3337_v44 }
 0x242   :  { %v2501_v45 = vpop.eup %2500 }
 0x243   :  { %v842_v46 = vadd.f32 1.0, %v2501_v45  ;;  %v3341_v45 = vld [vmem:[#allocation6 + $0x68] sm:$0xff] }
 0x244   :  { %v2503_v48 = vpop.eup %2502  ;;  %3811 = vst [vmem:[#allocation14_spill] sm:$0xff] %v3341_v45 }
 0x245   :  { %2508 = vrcp.f32 %v842_v46  ;;  %v848_v49 = vadd.f32 1.0, %v2503_v48  ;;  %v2505_v50 = vpop.eup %2504  ;;  %v3343_v46 = vld [vmem:[#allocation6 + $0x78] sm:$0xff]  ;;  %v3347_v48 = vld [vmem:[#allocation6 + $0x60] sm:$0xff] }
 0x246   :  { %v2507_v51 = vpop.eup %2506  ;;  %3812 = vst [vmem:[#allocation15_spill] sm:$0xff] %v3343_v46  ;;  %3813 = vst [vmem:[#allocation16_spill] sm:$0xff] %v3347_v48 }
 0x247   :  { %2510 = vrcp.f32 %v848_v49  ;;  %v855_v47 = vadd.f32 1.0, %v2507_v51  ;;  %v3349_v49 = vld [vmem:[#allocation6 + $0x70] sm:$0xff]  ;;  %v3355_v51 = vld [vmem:[#allocation6 + $0x58] sm:$0xff] }
 0x248   :  { %3814 = vst [vmem:[#allocation17_spill] sm:$0xff] %v3349_v49  ;;  %3816 = vst [vmem:[#allocation19_spill] sm:$0xff] %v3355_v51 }
 0x249   :  { %2512 = vrcp.f32 %v855_v47  ;;  %v3367_v47 = vld [vmem:[#allocation6 + $0x38] sm:$0xff] }
 0x24a   :  { %3820 = vst [vmem:[#allocation23_spill] sm:$0xff] %v3367_v47 }
 0x252   :  { %v2509_v20 = vpop.eup %2508 }
 0x253   :  { %v860_v62 = vmul.f32 %v2509_v20, %v2505_v50  ;;  %v3353_v50 = vld [vmem:[#allocation6 + $0x48] sm:$0xff]  ;;  %v3359_v20 = vld [vmem:[#allocation6 + $0x40] sm:$0xff] }
 0x254   :  { %v2511_v29 = vpop.eup %2510  ;;  %3815 = vst [vmem:[#allocation18_spill] sm:$0xff] %v3353_v50  ;;  %3817 = vst [vmem:[#allocation20_spill] sm:$0xff] %v3359_v20 }
 0x255   :  { %v859_v0 = vmul.f32 %v2511_v29, %v3124_v2  ;;  %v3227_v2 = vld [vmem:[#allocation6 + $0x1b8] sm:$0xff]  ;;  %v3365_v29 = vld [vmem:[#allocation6 + $0x28] sm:$0xff] }
 0x256   :  { %v2513_v63 = vpop.eup %2512  ;;  %3819 = vst [vmem:[#allocation22_spill] sm:$0xff] %v3365_v29 }
 0x257   :  { %v3196_v3 = vadd.f32 %v860_v62, %v859_v0  ;;  %v3361_v62 = vld [vmem:[#allocation6 + $0x50] sm:$0xff]  ;;  %v3371_v0 = vld [vmem:[#allocation6 + $0x20] sm:$0xff] }
 0x258   :  { %3818 = vst [vmem:[#allocation21_spill] sm:$0xff] %v3361_v62  ;;  %3821 = vst [vmem:[#allocation24_spill] sm:$0xff] %v3371_v0 }
 0x259   :  { %2514 = vtanh.f32 %v3196_v3 }
 0x266   :  { %v2515_v11 = vpop.eup %2514 }
 0x267   :  { %v863_v52 = vmul.f32 %v2515_v11, %v2513_v63  ;;  %v3373_v63 = vld [vmem:[#allocation6 + $0x30] sm:$0xff]  ;;  %v3377_v11 = vld [vmem:[#allocation6 + $0x8] sm:$0xff] }
 0x268   :  { %3822 = vst [vmem:[#allocation25_spill] sm:$0xff] %v3373_v63  ;;  %3823 = vst [vmem:[#allocation26_spill] sm:$0xff] %v3377_v11 }
 0x269   :  { %996 = vmatmul.mubr.f32.vlgmr.msra.gmra.mxu0 %v863_v52  ;;  %1067 = vmatmul.mubr.f32.vlgmr.msra.gmra.mxu1 %v863_v52  ;;  %v3379_v52 = vld [vmem:[#allocation6 + $0x18] sm:$0xff] }
 0x26a   :  { %1233 = vmatprep.mubr.f32.mxu0 %v3802_v26  ;;  %1304 = vmatprep.mubr.f32.mxu1 %v3802_v26  ;;  %3824 = vst [vmem:[#allocation27_spill] sm:$0xff] %v3379_v52  ;;  %v3383_v26 = vld [vmem:[#allocation6] sm:$0xff] }
 0x26b   :  { %1170 = vmatpush1.msra.mxu0 %v3207_v59  ;;  %1241 = vmatpush1.msra.mxu1 %v3209_v58  ;;  %3825 = vst [vmem:[#allocation28_spill] sm:$0xff] %v3383_v26 }
 0x26c   :  { %1171 = vmatprep.subr.mxu0 %v3213_v53  ;;  %1242 = vmatprep.subr.mxu1 %v3215_v57 }
 0x26d   :  { %1172 = vmatpush1.msra.mxu0 %v3219_v55  ;;  %1243 = vmatpush1.msra.mxu1 %v3221_v60 }
 0x26e   :  { %1173 = vmatprep.subr.mxu0 %v3225_v1  ;;  %1244 = vmatprep.subr.mxu1 %v3227_v2 }
 0x26f   :  { %1174 = vmatpush1.msra.mxu0 %v3231_v54  ;;  %1245 = vmatpush1.msra.mxu1 %v3233_v38 }
 0x270   :  { %1175 = vmatprep.subr.mxu0 %v3237_v4  ;;  %1246 = vmatprep.subr.mxu1 %v3239_v5 }
 0x271   :  { %1176 = vmatpush1.msra.mxu0 %v3243_v6  ;;  %1247 = vmatpush1.msra.mxu1 %v3245_v7 }
 0x272   :  { %1177 = vmatprep.subr.mxu0 %v3249_v8  ;;  %1248 = vmatprep.subr.mxu1 %v3251_v9 }
 0x273   :  { %1178 = vmatpush1.msra.mxu0 %v3255_v10  ;;  %1249 = vmatpush1.msra.mxu1 %v3257_v12 }
 0x274   :  { %1179 = vmatprep.subr.mxu0 %v3261_v13  ;;  %1250 = vmatprep.subr.mxu1 %v3263_v14 }
 0x275   :  { %1180 = vmatpush1.msra.mxu0 %v3267_v15  ;;  %1251 = vmatpush1.msra.mxu1 %v3269_v16 }
 0x276   :  { %1181 = vmatprep.subr.mxu0 %v3273_v17  ;;  %1252 = vmatprep.subr.mxu1 %v3275_v18 }
 0x277   :  { %1182 = vmatpush1.msra.mxu0 %v3279_v19  ;;  %1253 = vmatpush1.msra.mxu1 %v3281_v21 }
 0x278   :  { %1183 = vmatprep.subr.mxu0 %v3285_v22  ;;  %1254 = vmatprep.subr.mxu1 %v3287_v23 }
 0x279   :  { %1184 = vmatpush1.msra.mxu0 %v3289_v24  ;;  %1255 = vmatpush1.msra.mxu1 %v3293_v25 }
 0x27a   :  { %1185 = vmatprep.subr.mxu0 %v3295_v27  ;;  %1256 = vmatprep.subr.mxu1 %v3297_v28 }
 0x27b   :  { %1186 = vmatpush1.msra.mxu0 %v3301_v30  ;;  %1257 = vmatpush1.msra.mxu1 %v3303_v31 }
 0x27c   :  { %1187 = vmatprep.subr.mxu0 %v3305_v32  ;;  %1258 = vmatprep.subr.mxu1 %v3309_v33 }
 0x27d   :  { %1188 = vmatpush1.msra.mxu0 %v3311_v34  ;;  %1259 = vmatpush1.msra.mxu1 %v3313_v35 }
 0x27e   :  { %1189 = vmatprep.subr.mxu0 %v3317_v36  ;;  %1260 = vmatprep.subr.mxu1 %v3319_v37 }
 0x27f   :  { %1190 = vmatpush1.msra.mxu0 %v3323_v39  ;;  %1261 = vmatpush1.msra.mxu1 %v3325_v40 }
 0x280   :  { %1191 = vmatprep.subr.mxu0 %v3329_v41  ;;  %1262 = vmatprep.subr.mxu1 %v3331_v42 }
 0x281   :  { %1192 = vmatpush1.msra.mxu0 %v3335_v43  ;;  %1263 = vmatpush1.msra.mxu1 %v3337_v44 }
 0x282   :  { %1193 = vmatprep.subr.mxu0 %v3341_v45  ;;  %1264 = vmatprep.subr.mxu1 %v3343_v46  ;;  %v3830_v46 = vld [vmem:[#allocation36_spill] sm:$0xff] }
 0x283   :  { %1194 = vmatpush1.msra.mxu0 %v3347_v48  ;;  %1265 = vmatpush1.msra.mxu1 %v3349_v49  ;;  %v3829_v48 = vld [vmem:[#allocation38_spill] sm:$0xff] }
 0x284   :  { %1195 = vmatprep.subr.mxu0 %v3353_v50  ;;  %1266 = vmatprep.subr.mxu1 %v3355_v51  ;;  %v3385_v50 = vld [vmem:[#allocation6 + $0x10] sm:$0xff] }
 0x285   :  { %1196 = vmatpush1.msra.mxu0 %v3359_v20  ;;  %1267 = vmatpush1.msra.mxu1 %v3361_v62  ;;  %3826 = vst [vmem:[#allocation29_spill] sm:$0xff] %v3385_v50 }
 0x286   :  { %1197 = vmatprep.subr.mxu0 %v3365_v29  ;;  %1268 = vmatprep.subr.mxu1 %v3367_v47  ;;  %v3827_v29 = vld [vmem:[#allocation35_spill] sm:$0xff] }
 0x287   :  { %1198 = vmatpush1.msra.mxu0 %v3371_v0  ;;  %1269 = vmatpush1.msra.mxu1 %v3373_v63  ;;  %v3828_v0 = vld [vmem:[#allocation37_spill] sm:$0xff] }
 0x288   :  { %1199 = vmatprep.subr.mxu0 %v3377_v11  ;;  %1270 = vmatprep.subr.mxu1 %v3379_v52 }
 0x289   :  { %1200 = vmatpush1.msra.mxu0 %v3383_v26  ;;  %1271 = vmatpush1.msra.mxu1 %v3385_v50 }
 0x28a   :  { %1407 = vmatprep.subr.mxu0 %v3201_v61  ;;  %1478 = vmatprep.subr.mxu1 %v3203_v56 }
 0x329   :  { %v997_v47 = vpop.f32.mrf.mxu0  ;;  %v1068_v63 = vpop.f32.mrf.mxu1 }
 0x32a   :  { %v1073_v62 = vadd.f32 %v997_v47, %v3827_v29  ;;  %v1075_v50 = vadd.f32 %v1068_v63, %v3830_v46  ;;  %v3836_v63 = vld [vmem:[#allocation18_spill] sm:$0xff] }
 0x32b   :  { %v999_v20 = vpop.f32.mrf.mxu0  ;;  %v1070_v52 = vpop.f32.mrf.mxu1 }
 0x32c   :  { %v2404_v51 = vmul.f32 -1.442695, %v1073_v62  ;;  %v1074_v49 = vadd.f32 %v999_v20, %v3828_v0  ;;  %v1076_v26 = vadd.f32 %v1070_v52, %v3829_v48  ;;  %v3837_v52 = vld [vmem:[#allocation19_spill] sm:$0xff] }
 0x32e   :  { %2516 = vpow2.f32 %v2404_v51  ;;  %v2405_v11 = vmul.f32 -1.442695, %v1074_v49  ;;  %v2406_v45 = vmul.f32 -1.442695, %v1076_v26 }
 0x330   :  { %2518 = vpow2.f32 %v2405_v11 }
 0x331   :  { %2520 = vtanh.f32 %v1075_v50  ;;  %v3835_v50 = vld [vmem:[#allocation17_spill] sm:$0xff] }
 0x332   :  { %2522 = vpow2.f32 %v2406_v45  ;;  %v3834_v45 = vld [vmem:[#allocation16_spill] sm:$0xff] }
 0x33b   :  { %v2517_v61 = vpop.eup %2516 }
 0x33c   :  { %v1080_v44 = vadd.f32 1.0, %v2517_v61 }
 0x33d   :  { %v2519_v56 = vpop.eup %2518 }
 0x33e   :  { %2524 = vrcp.f32 %v1080_v44  ;;  %v1086_v29 = vadd.f32 1.0, %v2519_v56  ;;  %v2521_v62 = vpop.eup %2520  ;;  %v3832_v56 = vld [vmem:[#allocation14_spill] sm:$0xff]  ;;  %v3833_v44 = vld [vmem:[#allocation15_spill] sm:$0xff] }
 0x33f   :  { %v2523_v20 = vpop.eup %2522 }
 0x340   :  { %2526 = vrcp.f32 %v1086_v29  ;;  %v1093_v0 = vadd.f32 1.0, %v2523_v20  ;;  %v3838_v29 = vld [vmem:[#allocation20_spill] sm:$0xff]  ;;  %v3840_v20 = vld [vmem:[#allocation22_spill] sm:$0xff] }
 0x342   :  { %2528 = vrcp.f32 %v1093_v0  ;;  %v3844_v0 = vld [vmem:[#allocation26_spill] sm:$0xff] }
 0x34b   :  { %v2525_v51 = vpop.eup %2524 }
 0x34c   :  { %v1098_v47 = vmul.f32 %v2525_v51, %v2521_v62  ;;  %v3839_v62 = vld [vmem:[#allocation21_spill] sm:$0xff]  ;;  %v3841_v51 = vld [vmem:[#allocation23_spill] sm:$0xff] }
 0x34d   :  { %v2527_v49 = vpop.eup %2526 }
 0x34e   :  { %v1097_v11 = vmul.f32 %v2527_v49, %v3196_v3  ;;  %v3831_v3 = vld [vmem:[#allocation13_spill] sm:$0xff] }
 0x34f   :  { %v2529_v26 = vpop.eup %2528  ;;  %v3843_v49 = vld [vmem:[#allocation25_spill] sm:$0xff] }
 0x350   :  { %v3400_v48 = vadd.f32 %v1098_v47, %v1097_v11  ;;  %v3842_v47 = vld [vmem:[#allocation24_spill] sm:$0xff]  ;;  %v3845_v11 = vld [vmem:[#allocation27_spill] sm:$0xff] }
 0x352   :  { %2530 = vtanh.f32 %v3400_v48 }
 0x35f   :  { %v2531_v61 = vpop.eup %2530 }
 0x360   :  { %v1101_v46 = vmul.f32 %v2531_v61, %v2529_v26  ;;  %v3846_v26 = vld [vmem:[#allocation28_spill] sm:$0xff]  ;;  %v3847_v61 = vmov 0.0  }
 0x362   :  { %1234 = vmatmul.mubr.f32.vlgmr.msra.gmra.mxu0 %v1101_v46  ;;  %1305 = vmatmul.mubr.f32.vlgmr.msra.gmra.mxu1 %v1101_v46  ;;  %v3848_v46 = vld [vmem:[#allocation29_spill] sm:$0xff] }
 0x363   :  { %1408 = vmatpush1.msra.mxu0 %v3207_v59  ;;  %1479 = vmatpush1.msra.mxu1 %v3209_v58 }
 0x364   :  { %1409 = vmatprep.subr.mxu0 %v3213_v53  ;;  %1480 = vmatprep.subr.mxu1 %v3215_v57 }
 0x365   :  { %1410 = vmatpush1.msra.mxu0 %v3219_v55  ;;  %1481 = vmatpush1.msra.mxu1 %v3221_v60 }
 0x366   :  { %1411 = vmatprep.subr.mxu0 %v3225_v1  ;;  %1482 = vmatprep.subr.mxu1 %v3227_v2 }
 0x367   :  { %1412 = vmatpush1.msra.mxu0 %v3231_v54  ;;  %1483 = vmatpush1.msra.mxu1 %v3233_v38 }
 0x368   :  { %1413 = vmatprep.subr.mxu0 %v3237_v4  ;;  %1484 = vmatprep.subr.mxu1 %v3239_v5 }
 0x369   :  { %1414 = vmatpush1.msra.mxu0 %v3243_v6  ;;  %1485 = vmatpush1.msra.mxu1 %v3245_v7 }
 0x36a   :  { %1415 = vmatprep.subr.mxu0 %v3249_v8  ;;  %1486 = vmatprep.subr.mxu1 %v3251_v9 }
 0x36b   :  { %1416 = vmatpush1.msra.mxu0 %v3255_v10  ;;  %1487 = vmatpush1.msra.mxu1 %v3257_v12 }
 0x36c   :  { %1417 = vmatprep.subr.mxu0 %v3261_v13  ;;  %1488 = vmatprep.subr.mxu1 %v3263_v14 }
 0x36d   :  { %1418 = vmatpush1.msra.mxu0 %v3267_v15  ;;  %1489 = vmatpush1.msra.mxu1 %v3269_v16 }
 0x36e   :  { %1419 = vmatprep.subr.mxu0 %v3273_v17  ;;  %1490 = vmatprep.subr.mxu1 %v3275_v18 }
 0x36f   :  { %1420 = vmatpush1.msra.mxu0 %v3279_v19  ;;  %1491 = vmatpush1.msra.mxu1 %v3281_v21 }
 0x370   :  { %1421 = vmatprep.subr.mxu0 %v3285_v22  ;;  %1492 = vmatprep.subr.mxu1 %v3287_v23 }
 0x371   :  { %1422 = vmatpush1.msra.mxu0 %v3289_v24  ;;  %1493 = vmatpush1.msra.mxu1 %v3293_v25 }
 0x372   :  { %1423 = vmatprep.subr.mxu0 %v3295_v27  ;;  %1494 = vmatprep.subr.mxu1 %v3297_v28 }
 0x373   :  { %1424 = vmatpush1.msra.mxu0 %v3301_v30  ;;  %1495 = vmatpush1.msra.mxu1 %v3303_v31 }
 0x374   :  { %1425 = vmatprep.subr.mxu0 %v3305_v32  ;;  %1496 = vmatprep.subr.mxu1 %v3309_v33 }
 0x375   :  { %1426 = vmatpush1.msra.mxu0 %v3311_v34  ;;  %1497 = vmatpush1.msra.mxu1 %v3313_v35 }
 0x376   :  { %1427 = vmatprep.subr.mxu0 %v3317_v36  ;;  %1498 = vmatprep.subr.mxu1 %v3319_v37 }
 0x377   :  { %1428 = vmatpush1.msra.mxu0 %v3323_v39  ;;  %1499 = vmatpush1.msra.mxu1 %v3325_v40 }
 0x378   :  { %1429 = vmatprep.subr.mxu0 %v3329_v41  ;;  %1500 = vmatprep.subr.mxu1 %v3331_v42 }
 0x379   :  { %1430 = vmatpush1.msra.mxu0 %v3335_v43  ;;  %1501 = vmatpush1.msra.mxu1 %v3831_v3 }
 0x37a   :  { %1431 = vmatprep.subr.mxu0 %v3832_v56  ;;  %1502 = vmatprep.subr.mxu1 %v3833_v44  ;;  %v3854_v44 = vld [vmem:[#allocation40_spill] sm:$0xff] }
 0x37b   :  { %1432 = vmatpush1.msra.mxu0 %v3834_v45  ;;  %1503 = vmatpush1.msra.mxu1 %v3835_v50  ;;  %v3853_v45 = vld [vmem:[#allocation42_spill] sm:$0xff] }
 0x37c   :  { %1433 = vmatprep.subr.mxu0 %v3836_v63  ;;  %1504 = vmatprep.subr.mxu1 %v3837_v52 }
 0x37d   :  { %1434 = vmatpush1.msra.mxu0 %v3838_v29  ;;  %1505 = vmatpush1.msra.mxu1 %v3839_v62  ;;  %v3849_v62 = vld [vmem:[#allocation11_spill] sm:$0xff] }
 0x37e   :  { %1435 = vmatprep.subr.mxu0 %v3840_v20  ;;  %1506 = vmatprep.subr.mxu1 %v3841_v51  ;;  %v3850_v20 = vld [vmem:[#allocation12_spill] sm:$0xff] }
 0x37f   :  { %1436 = vmatpush1.msra.mxu0 %v3842_v47  ;;  %1507 = vmatpush1.msra.mxu1 %v3843_v49  ;;  %v3851_v47 = vld [vmem:[#allocation39_spill] sm:$0xff] }
 0x380   :  { %1437 = vmatprep.subr.mxu0 %v3844_v0  ;;  %1508 = vmatprep.subr.mxu1 %v3845_v11  ;;  %v3852_v0 = vld [vmem:[#allocation41_spill] sm:$0xff] }
 0x381   :  { %1438 = vmatpush1.msra.mxu0 %v3846_v26  ;;  %1471 = vmatprep.mubr.f32.mxu0 %v3847_v61 }
 0x382   :  { %1509 = vmatpush1.msra.mxu1 %v3848_v46  ;;  %1542 = vmatprep.mubr.f32.mxu1 %v3847_v61 }
 0x383   :  { %1645 = vmatprep.subr.mxu0 %v3849_v62  ;;  %1716 = vmatprep.subr.mxu1 %v3850_v20 }
 0x422   :  { %v1235_v51 = vpop.f32.mrf.mxu0  ;;  %v1306_v11 = vpop.f32.mrf.mxu1 }
 0x423   :  { %v1311_v29 = vadd.f32 %v1235_v51, %v3851_v47  ;;  %v1313_v61 = vadd.f32 %v1306_v11, %v3854_v44  ;;  %v3859_v11 = vld [vmem:[#allocation17_spill] sm:$0xff] }
 0x424   :  { %v1237_v49 = vpop.f32.mrf.mxu0  ;;  %v1308_v50 = vpop.f32.mrf.mxu1 }
 0x425   :  { %v2407_v52 = vmul.f32 -1.442695, %v1311_v29  ;;  %v1312_v63 = vadd.f32 %v1237_v49, %v3852_v0  ;;  %v1314_v46 = vadd.f32 %v1308_v50, %v3853_v45 }
 0x427   :  { %2532 = vpow2.f32 %v2407_v52  ;;  %v2408_v26 = vmul.f32 -1.442695, %v1312_v63  ;;  %v2409_v56 = vmul.f32 -1.442695, %v1314_v46  ;;  %v3861_v46 = vld [vmem:[#allocation19_spill] sm:$0xff] }
 0x429   :  { %2534 = vpow2.f32 %v2408_v26 }
 0x42a   :  { %2536 = vtanh.f32 %v1313_v61  ;;  %v3860_v61 = vld [vmem:[#allocation18_spill] sm:$0xff] }
 0x42b   :  { %2538 = vpow2.f32 %v2409_v56  ;;  %v3857_v56 = vld [vmem:[#allocation15_spill] sm:$0xff] }
 0x434   :  { %v2533_v62 = vpop.eup %2532 }
 0x435   :  { %v1318_v3 = vadd.f32 1.0, %v2533_v62 }
 0x436   :  { %v2535_v20 = vpop.eup %2534 }
 0x437   :  { %2540 = vrcp.f32 %v1318_v3  ;;  %v1324_v51 = vadd.f32 1.0, %v2535_v20  ;;  %v2537_v29 = vpop.eup %2536  ;;  %v3856_v3 = vld [vmem:[#allocation14_spill] sm:$0xff]  ;;  %v3858_v20 = vld [vmem:[#allocation16_spill] sm:$0xff] }
 0x438   :  { %v2539_v47 = vpop.eup %2538 }
 0x439   :  { %2542 = vrcp.f32 %v1324_v51  ;;  %v1331_v0 = vadd.f32 1.0, %v2539_v47  ;;  %v3862_v51 = vld [vmem:[#allocation20_spill] sm:$0xff]  ;;  %v3864_v47 = vld [vmem:[#allocation22_spill] sm:$0xff] }
 0x43b   :  { %2544 = vrcp.f32 %v1331_v0  ;;  %v3868_v0 = vld [vmem:[#allocation26_spill] sm:$0xff] }
 0x444   :  { %v2541_v52 = vpop.eup %2540 }
 0x445   :  { %v1336_v49 = vmul.f32 %v2541_v52, %v2537_v29  ;;  %v3863_v29 = vld [vmem:[#allocation21_spill] sm:$0xff]  ;;  %v3865_v52 = vld [vmem:[#allocation23_spill] sm:$0xff] }
 0x446   :  { %v2543_v63 = vpop.eup %2542 }
 0x447   :  { %v1335_v26 = vmul.f32 %v2543_v63, %v3400_v48  ;;  %v3855_v48 = vld [vmem:[#allocation13_spill] sm:$0xff] }
 0x448   :  { %v2545_v44 = vpop.eup %2544  ;;  %v3867_v63 = vld [vmem:[#allocation25_spill] sm:$0xff] }
 0x449   :  { %v3474_v45 = vadd.f32 %v1336_v49, %v1335_v26  ;;  %v3866_v49 = vld [vmem:[#allocation24_spill] sm:$0xff]  ;;  %v3869_v26 = vld [vmem:[#allocation27_spill] sm:$0xff] }
 0x44b   :  { %2546 = vtanh.f32 %v3474_v45 }
 0x458   :  { %v2547_v50 = vpop.eup %2546 }
 0x459   :  { %v1339_v62 = vmul.f32 %v2547_v50, %v2545_v44  ;;  %v3870_v44 = vld [vmem:[#allocation28_spill] sm:$0xff]  ;;  %v3871_v50 = vmov 0.0  }
 0x45b   :  { %1472 = vmatmul.mubr.f32.vlgmr.msra.gmra.mxu0 %v1339_v62  ;;  %1543 = vmatmul.mubr.f32.vlgmr.msra.gmra.mxu1 %v1339_v62  ;;  %v3872_v62 = vld [vmem:[#allocation29_spill] sm:$0xff] }
 0x45c   :  { %1646 = vmatpush1.msra.mxu0 %v3207_v59  ;;  %1717 = vmatpush1.msra.mxu1 %v3209_v58 }
 0x45d   :  { %1647 = vmatprep.subr.mxu0 %v3213_v53  ;;  %1718 = vmatprep.subr.mxu1 %v3215_v57 }
 0x45e   :  { %1648 = vmatpush1.msra.mxu0 %v3219_v55  ;;  %1719 = vmatpush1.msra.mxu1 %v3221_v60 }
 0x45f   :  { %1649 = vmatprep.subr.mxu0 %v3225_v1  ;;  %1720 = vmatprep.subr.mxu1 %v3227_v2 }
 0x460   :  { %1650 = vmatpush1.msra.mxu0 %v3231_v54  ;;  %1721 = vmatpush1.msra.mxu1 %v3233_v38 }
 0x461   :  { %1651 = vmatprep.subr.mxu0 %v3237_v4  ;;  %1722 = vmatprep.subr.mxu1 %v3239_v5 }
 0x462   :  { %1652 = vmatpush1.msra.mxu0 %v3243_v6  ;;  %1723 = vmatpush1.msra.mxu1 %v3245_v7 }
 0x463   :  { %1653 = vmatprep.subr.mxu0 %v3249_v8  ;;  %1724 = vmatprep.subr.mxu1 %v3251_v9 }
 0x464   :  { %1654 = vmatpush1.msra.mxu0 %v3255_v10  ;;  %1725 = vmatpush1.msra.mxu1 %v3257_v12 }
 0x465   :  { %1655 = vmatprep.subr.mxu0 %v3261_v13  ;;  %1726 = vmatprep.subr.mxu1 %v3263_v14 }
 0x466   :  { %1656 = vmatpush1.msra.mxu0 %v3267_v15  ;;  %1727 = vmatpush1.msra.mxu1 %v3269_v16 }
 0x467   :  { %1657 = vmatprep.subr.mxu0 %v3273_v17  ;;  %1728 = vmatprep.subr.mxu1 %v3275_v18 }
 0x468   :  { %1658 = vmatpush1.msra.mxu0 %v3279_v19  ;;  %1729 = vmatpush1.msra.mxu1 %v3281_v21 }
 0x469   :  { %1659 = vmatprep.subr.mxu0 %v3285_v22  ;;  %1730 = vmatprep.subr.mxu1 %v3287_v23 }
 0x46a   :  { %1660 = vmatpush1.msra.mxu0 %v3289_v24  ;;  %1731 = vmatpush1.msra.mxu1 %v3293_v25 }
 0x46b   :  { %1661 = vmatprep.subr.mxu0 %v3295_v27  ;;  %1732 = vmatprep.subr.mxu1 %v3297_v28 }
 0x46c   :  { %1662 = vmatpush1.msra.mxu0 %v3301_v30  ;;  %1733 = vmatpush1.msra.mxu1 %v3303_v31 }
 0x46d   :  { %1663 = vmatprep.subr.mxu0 %v3305_v32  ;;  %1734 = vmatprep.subr.mxu1 %v3309_v33 }
 0x46e   :  { %1664 = vmatpush1.msra.mxu0 %v3311_v34  ;;  %1735 = vmatpush1.msra.mxu1 %v3313_v35 }
 0x46f   :  { %1665 = vmatprep.subr.mxu0 %v3317_v36  ;;  %1736 = vmatprep.subr.mxu1 %v3319_v37 }
 0x470   :  { %1666 = vmatpush1.msra.mxu0 %v3323_v39  ;;  %1737 = vmatpush1.msra.mxu1 %v3325_v40 }
 0x471   :  { %1667 = vmatprep.subr.mxu0 %v3329_v41  ;;  %1738 = vmatprep.subr.mxu1 %v3331_v42 }
 0x472   :  { %1668 = vmatpush1.msra.mxu0 %v3335_v43  ;;  %1739 = vmatpush1.msra.mxu1 %v3855_v48 }
 0x473   :  { %1669 = vmatprep.subr.mxu0 %v3856_v3  ;;  %1740 = vmatprep.subr.mxu1 %v3857_v56  ;;  %v3878_v56 = vld [vmem:[#allocation44_spill] sm:$0xff] }
 0x474   :  { %1670 = vmatpush1.msra.mxu0 %v3858_v20  ;;  %1741 = vmatpush1.msra.mxu1 %v3859_v11  ;;  %v3877_v20 = vld [vmem:[#allocation46_spill] sm:$0xff] }
 0x475   :  { %1671 = vmatprep.subr.mxu0 %v3860_v61  ;;  %1742 = vmatprep.subr.mxu1 %v3861_v46 }
 0x476   :  { %1672 = vmatpush1.msra.mxu0 %v3862_v51  ;;  %1743 = vmatpush1.msra.mxu1 %v3863_v29  ;;  %v3873_v29 = vld [vmem:[#allocation11_spill] sm:$0xff] }
 0x477   :  { %1673 = vmatprep.subr.mxu0 %v3864_v47  ;;  %1744 = vmatprep.subr.mxu1 %v3865_v52  ;;  %v3874_v47 = vld [vmem:[#allocation12_spill] sm:$0xff] }
 0x478   :  { %1674 = vmatpush1.msra.mxu0 %v3866_v49  ;;  %1745 = vmatpush1.msra.mxu1 %v3867_v63  ;;  %v3875_v49 = vld [vmem:[#allocation43_spill] sm:$0xff] }
 0x479   :  { %1675 = vmatprep.subr.mxu0 %v3868_v0  ;;  %1746 = vmatprep.subr.mxu1 %v3869_v26  ;;  %v3876_v0 = vld [vmem:[#allocation45_spill] sm:$0xff] }
 0x47a   :  { %1676 = vmatpush1.msra.mxu0 %v3870_v44  ;;  %1709 = vmatprep.mubr.f32.mxu0 %v3871_v50 }
 0x47b   :  { %1747 = vmatpush1.msra.mxu1 %v3872_v62  ;;  %1780 = vmatprep.mubr.f32.mxu1 %v3871_v50 }
 0x47c   :  { %1883 = vmatprep.subr.mxu0 %v3873_v29  ;;  %1954 = vmatprep.subr.mxu1 %v3874_v47 }
 0x51b   :  { %v1473_v52 = vpop.f32.mrf.mxu0  ;;  %v1544_v26 = vpop.f32.mrf.mxu1 }
 0x51c   :  { %v1549_v51 = vadd.f32 %v1473_v52, %v3875_v49  ;;  %v1551_v50 = vadd.f32 %v1544_v26, %v3878_v56 }
 0x51d   :  { %v1475_v63 = vpop.f32.mrf.mxu0  ;;  %v1546_v11 = vpop.f32.mrf.mxu1 }
 0x51e   :  { %v2410_v46 = vmul.f32 -1.442695, %v1549_v51  ;;  %v1550_v61 = vadd.f32 %v1475_v63, %v3876_v0  ;;  %v1552_v62 = vadd.f32 %v1546_v11, %v3877_v20 }
 0x520   :  { %2548 = vpow2.f32 %v2410_v46  ;;  %v2411_v44 = vmul.f32 -1.442695, %v1550_v61  ;;  %v2412_v3 = vmul.f32 -1.442695, %v1552_v62  ;;  %v2120_v62 = vld [vmem:[#allocation6 + $0x1f8] sm:$0xff] }
 0x522   :  { %2550 = vpow2.f32 %v2411_v44 }
 0x523   :  { %2552 = vtanh.f32 %v1551_v50  ;;  %v2118_v50 = vld [vmem:[#allocation6 + $0x1e8] sm:$0xff] }
 0x524   :  { %2554 = vpow2.f32 %v2412_v3 }
 0x52d   :  { %v2549_v29 = vpop.eup %2548 }
 0x52e   :  { %v1556_v48 = vadd.f32 1.0, %v2549_v29  ;;  %v2117_v29 = vld [vmem:[#allocation6 + $0x1e0] sm:$0xff] }
 0x52f   :  { %v2551_v47 = vpop.eup %2550 }
 0x530   :  { %2556 = vrcp.f32 %v1556_v48  ;;  %v1562_v52 = vadd.f32 1.0, %v2551_v47  ;;  %v2553_v51 = vpop.eup %2552  ;;  %v2119_v47 = vld [vmem:[#allocation6 + $0x1f0] sm:$0xff] }
 0x531   :  { %v2555_v49 = vpop.eup %2554 }
 0x532   :  { %2558 = vrcp.f32 %v1562_v52  ;;  %v1569_v0 = vadd.f32 1.0, %v2555_v49  ;;  %v2114_v52 = vld [vmem:[#allocation6 + $0x1c8] sm:$0xff]  ;;  %v2113_v49 = vld [vmem:[#allocation6 + $0x1c0] sm:$0xff] }
 0x534   :  { %2560 = vrcp.f32 %v1569_v0  ;;  %v2109_v0 = vld [vmem:[#allocation6 + $0x1a0] sm:$0xff] }
 0x53d   :  { %v2557_v46 = vpop.eup %2556 }
 0x53e   :  { %v1574_v63 = vmul.f32 %v2557_v46, %v2553_v51  ;;  %v2116_v51 = vld [vmem:[#allocation6 + $0x1d8] sm:$0xff]  ;;  %v2115_v46 = vld [vmem:[#allocation6 + $0x1d0] sm:$0xff] }
 0x53f   :  { %v2559_v61 = vpop.eup %2558 }
 0x540   :  { %v1573_v44 = vmul.f32 %v2559_v61, %v3474_v45  ;;  %v2112_v61 = vld [vmem:[#allocation6 + $0x1b8] sm:$0xff] }
 0x541   :  { %v2561_v56 = vpop.eup %2560 }
 0x542   :  { %v3548_v20 = vadd.f32 %v1574_v63, %v1573_v44  ;;  %v2110_v63 = vld [vmem:[#allocation6 + $0x1a8] sm:$0xff]  ;;  %v2111_v44 = vld [vmem:[#allocation6 + $0x1b0] sm:$0xff] }
 0x544   :  { %2562 = vtanh.f32 %v3548_v20 }
 0x551   :  { %v2563_v11 = vpop.eup %2562 }
 0x552   :  { %v1577_v26 = vmul.f32 %v2563_v11, %v2561_v56  ;;  %v2108_v56 = vld [vmem:[#allocation6 + $0x198] sm:$0xff]  ;;  %v2105_v11 = vld [vmem:[#allocation6 + $0x180] sm:$0xff] }
 0x554   :  { %1710 = vmatmul.mubr.f32.vlgmr.msra.gmra.mxu0 %v1577_v26  ;;  %1781 = vmatmul.mubr.f32.vlgmr.msra.gmra.mxu1 %v1577_v26  ;;  %v2107_v26 = vld [vmem:[#allocation6 + $0x190] sm:$0xff] }
 0x555   :  { %1884 = vmatpush1.msra.mxu0 %v3207_v59  ;;  %1955 = vmatpush1.msra.mxu1 %v3209_v58  ;;  %v3879_v59 = vld [vmem:[#allocation13_spill] sm:$0xff]  ;;  %v3880_v58 = vld [vmem:[#allocation14_spill] sm:$0xff] }
 0x556   :  { %1885 = vmatprep.subr.mxu0 %v3213_v53  ;;  %1956 = vmatprep.subr.mxu1 %v3215_v57  ;;  %v3881_v53 = vld [vmem:[#allocation15_spill] sm:$0xff]  ;;  %v3882_v57 = vld [vmem:[#allocation16_spill] sm:$0xff] }
 0x557   :  { %1886 = vmatpush1.msra.mxu0 %v3219_v55  ;;  %1957 = vmatpush1.msra.mxu1 %v3221_v60  ;;  %v3883_v55 = vld [vmem:[#allocation17_spill] sm:$0xff]  ;;  %v3884_v60 = vld [vmem:[#allocation18_spill] sm:$0xff] }
 0x558   :  { %1887 = vmatprep.subr.mxu0 %v3225_v1  ;;  %1958 = vmatprep.subr.mxu1 %v3227_v2  ;;  %v3885_v1 = vld [vmem:[#allocation19_spill] sm:$0xff]  ;;  %v3886_v2 = vld [vmem:[#allocation20_spill] sm:$0xff] }
 0x559   :  { %1888 = vmatpush1.msra.mxu0 %v3231_v54  ;;  %1959 = vmatpush1.msra.mxu1 %v3233_v38  ;;  %v3887_v54 = vld [vmem:[#allocation21_spill] sm:$0xff]  ;;  %v3888_v38 = vld [vmem:[#allocation22_spill] sm:$0xff] }
 0x55a   :  { %1889 = vmatprep.subr.mxu0 %v3237_v4  ;;  %1960 = vmatprep.subr.mxu1 %v3239_v5  ;;  %v3889_v4 = vld [vmem:[#allocation23_spill] sm:$0xff]  ;;  %v3890_v5 = vld [vmem:[#allocation24_spill] sm:$0xff] }
 0x55b   :  { %1890 = vmatpush1.msra.mxu0 %v3243_v6  ;;  %1961 = vmatpush1.msra.mxu1 %v3245_v7  ;;  %v3891_v6 = vld [vmem:[#allocation25_spill] sm:$0xff]  ;;  %v3892_v7 = vld [vmem:[#allocation26_spill] sm:$0xff] }
 0x55c   :  { %1891 = vmatprep.subr.mxu0 %v3249_v8  ;;  %1962 = vmatprep.subr.mxu1 %v3251_v9  ;;  %v3893_v8 = vld [vmem:[#allocation27_spill] sm:$0xff]  ;;  %v3894_v9 = vld [vmem:[#allocation28_spill] sm:$0xff] }
 0x55d   :  { %1892 = vmatpush1.msra.mxu0 %v3255_v10  ;;  %1963 = vmatpush1.msra.mxu1 %v3257_v12  ;;  %v3895_v10 = vmov 0.0   ;;  %v3896_v12 = vld [vmem:[#allocation29_spill] sm:$0xff] }
 0x55e   :  { %1893 = vmatprep.subr.mxu0 %v3261_v13  ;;  %1964 = vmatprep.subr.mxu1 %v3263_v14  ;;  %v3897_v14 = vld [vmem:[#allocation47_spill] sm:$0xff] }
 0x55f   :  { %1894 = vmatpush1.msra.mxu0 %v3267_v15  ;;  %1965 = vmatpush1.msra.mxu1 %v3269_v16 }
 0x560   :  { %1895 = vmatprep.subr.mxu0 %v3273_v17  ;;  %1966 = vmatprep.subr.mxu1 %v3275_v18  ;;  %v3898_v18 = vld [vmem:[#allocation49_spill] sm:$0xff] }
 0x561   :  { %1896 = vmatpush1.msra.mxu0 %v3279_v19  ;;  %1967 = vmatpush1.msra.mxu1 %v3281_v21 }
 0x562   :  { %1897 = vmatprep.subr.mxu0 %v3285_v22  ;;  %1968 = vmatprep.subr.mxu1 %v3287_v23 }
 0x563   :  { %1898 = vmatpush1.msra.mxu0 %v3289_v24  ;;  %1969 = vmatpush1.msra.mxu1 %v3293_v25  ;;  %v3899_v24 = vld [vmem:[#allocation50_spill] sm:$0xff] }
 0x564   :  { %1899 = vmatprep.subr.mxu0 %v3295_v27  ;;  %1970 = vmatprep.subr.mxu1 %v3297_v28  ;;  %v3900_v27 = vld [vmem:[#allocation48_spill] sm:$0xff] }
 0x565   :  { %1900 = vmatpush1.msra.mxu0 %v3301_v30  ;;  %1971 = vmatpush1.msra.mxu1 %v3303_v31 }
 0x566   :  { %1901 = vmatprep.subr.mxu0 %v3305_v32  ;;  %1972 = vmatprep.subr.mxu1 %v3309_v33 }
 0x567   :  { %1902 = vmatpush1.msra.mxu0 %v3311_v34  ;;  %1973 = vmatpush1.msra.mxu1 %v3313_v35 }
 0x568   :  { %1903 = vmatprep.subr.mxu0 %v3317_v36  ;;  %1974 = vmatprep.subr.mxu1 %v3319_v37 }
 0x569   :  { %1904 = vmatpush1.msra.mxu0 %v3323_v39  ;;  %1975 = vmatpush1.msra.mxu1 %v3325_v40 }
 0x56a   :  { %1905 = vmatprep.subr.mxu0 %v3329_v41  ;;  %1976 = vmatprep.subr.mxu1 %v3331_v42 }
 0x56b   :  { %1906 = vmatpush1.msra.mxu0 %v3335_v43  ;;  %1977 = vmatpush1.msra.mxu1 %v3879_v59  ;;  %v2102_v59 = vld [vmem:[#allocation6 + $0x168] sm:$0xff] }
 0x56c   :  { %1907 = vmatprep.subr.mxu0 %v3880_v58  ;;  %1978 = vmatprep.subr.mxu1 %v3881_v53  ;;  %v2104_v58 = vld [vmem:[#allocation6 + $0x178] sm:$0xff]  ;;  %v2101_v53 = vld [vmem:[#allocation6 + $0x160] sm:$0xff] }
 0x56d   :  { %1908 = vmatpush1.msra.mxu0 %v3882_v57  ;;  %1979 = vmatpush1.msra.mxu1 %v3883_v55  ;;  %v2103_v57 = vld [vmem:[#allocation6 + $0x170] sm:$0xff]  ;;  %v2098_v55 = vld [vmem:[#allocation6 + $0x148] sm:$0xff] }
 0x56e   :  { %1909 = vmatprep.subr.mxu0 %v3884_v60  ;;  %1980 = vmatprep.subr.mxu1 %v3885_v1  ;;  %v2100_v60 = vld [vmem:[#allocation6 + $0x158] sm:$0xff]  ;;  %v2097_v1 = vld [vmem:[#allocation6 + $0x140] sm:$0xff] }
 0x56f   :  { %1910 = vmatpush1.msra.mxu0 %v3886_v2  ;;  %1981 = vmatpush1.msra.mxu1 %v3887_v54  ;;  %v2099_v2 = vld [vmem:[#allocation6 + $0x150] sm:$0xff]  ;;  %v2094_v54 = vld [vmem:[#allocation6 + $0x128] sm:$0xff] }
 0x570   :  { %1911 = vmatprep.subr.mxu0 %v3888_v38  ;;  %1982 = vmatprep.subr.mxu1 %v3889_v4  ;;  %v2096_v38 = vld [vmem:[#allocation6 + $0x138] sm:$0xff]  ;;  %v2093_v4 = vld [vmem:[#allocation6 + $0x120] sm:$0xff] }
 0x571   :  { %1912 = vmatpush1.msra.mxu0 %v3890_v5  ;;  %1983 = vmatpush1.msra.mxu1 %v3891_v6  ;;  %v2095_v5 = vld [vmem:[#allocation6 + $0x130] sm:$0xff]  ;;  %v2090_v6 = vld [vmem:[#allocation6 + $0x108] sm:$0xff] }
 0x572   :  { %1913 = vmatprep.subr.mxu0 %v3892_v7  ;;  %1984 = vmatprep.subr.mxu1 %v3893_v8  ;;  %v2092_v7 = vld [vmem:[#allocation6 + $0x118] sm:$0xff]  ;;  %v2089_v8 = vld [vmem:[#allocation6 + $0x100] sm:$0xff] }
 0x573   :  { %1914 = vmatpush1.msra.mxu0 %v3894_v9  ;;  %1947 = vmatprep.mubr.f32.mxu0 %v3895_v10  ;;  %v2091_v9 = vld [vmem:[#allocation6 + $0x110] sm:$0xff] }
 0x574   :  { %1985 = vmatpush1.msra.mxu1 %v3896_v12  ;;  %2018 = vmatprep.mubr.f32.mxu1 %v3895_v10  ;;  %v2086_v12 = vld [vmem:[#allocation6 + $0xe8] sm:$0xff] }
 0x575   :  { %2121 = vmatprep.subr.mxu0 %v2118_v50  ;;  %2192 = vmatprep.subr.mxu1 %v2120_v62  ;;  %v2057_v50 = vld [vmem:[#allocation6] sm:$0xff]  ;;  %v2059_v62 = vld [vmem:[#allocation6 + $0x10] sm:$0xff] }
 0x614   :  { %v1711_v13 = vpop.f32.mrf.mxu0  ;;  %v1782_v21 = vpop.f32.mrf.mxu1 }
 0x615   :  { %v1787_v15 = vadd.f32 %v1711_v13, %v3897_v14  ;;  %v1789_v28 = vadd.f32 %v1782_v21, %v3900_v27  ;;  %v2088_v13 = vld [vmem:[#allocation6 + $0xf8] sm:$0xff]  ;;  %v2085_v14 = vld [vmem:[#allocation6 + $0xe0] sm:$0xff]  ;;  %v2078_v21 = vld [vmem:[#allocation6 + $0xa8] sm:$0xff] }
 0x616   :  { %v1713_v16 = vpop.f32.mrf.mxu0  ;;  %v1784_v23 = vpop.f32.mrf.mxu1  ;;  %v2076_v27 = vld [vmem:[#allocation6 + $0x98] sm:$0xff] }
 0x617   :  { %v2413_v17 = vmul.f32 -1.442695, %v1787_v15  ;;  %v1788_v19 = vadd.f32 %v1713_v16, %v3898_v18  ;;  %v1790_v25 = vadd.f32 %v1784_v23, %v3899_v24  ;;  %v2087_v15 = vld [vmem:[#allocation6 + $0xf0] sm:$0xff]  ;;  %v2082_v16 = vld [vmem:[#allocation6 + $0xc8] sm:$0xff]  ;;  %v2081_v18 = vld [vmem:[#allocation6 + $0xc0] sm:$0xff] }
 0x618   :  { %v2077_v23 = vld [vmem:[#allocation6 + $0xa0] sm:$0xff]  ;;  %v2079_v24 = vld [vmem:[#allocation6 + $0xb0] sm:$0xff] }
 0x619   :  { %2564 = vpow2.f32 %v2413_v17  ;;  %v2414_v22 = vmul.f32 -1.442695, %v1788_v19  ;;  %v2415_v30 = vmul.f32 -1.442695, %v1790_v25  ;;  %v2084_v17 = vld [vmem:[#allocation6 + $0xd8] sm:$0xff]  ;;  %v2083_v19 = vld [vmem:[#allocation6 + $0xd0] sm:$0xff] }
 0x61a   :  { %v2074_v25 = vld [vmem:[#allocation6 + $0x88] sm:$0xff] }
 0x61b   :  { %2566 = vpow2.f32 %v2414_v22  ;;  %v2080_v22 = vld [vmem:[#allocation6 + $0xb8] sm:$0xff] }
 0x61c   :  { %2568 = vtanh.f32 %v1789_v28  ;;  %v2073_v28 = vld [vmem:[#allocation6 + $0x80] sm:$0xff] }
 0x61d   :  { %2570 = vpow2.f32 %v2415_v30  ;;  %v2075_v30 = vld [vmem:[#allocation6 + $0x90] sm:$0xff] }
 0x626   :  { %v2565_v31 = vpop.eup %2564 }
 0x627   :  { %v1794_v32 = vadd.f32 1.0, %v2565_v31  ;;  %v2070_v31 = vld [vmem:[#allocation6 + $0x68] sm:$0xff] }
 0x628   :  { %v2567_v33 = vpop.eup %2566 }
 0x629   :  { %2572 = vrcp.f32 %v1794_v32  ;;  %v1800_v34 = vadd.f32 1.0, %v2567_v33  ;;  %v2569_v35 = vpop.eup %2568  ;;  %v2072_v32 = vld [vmem:[#allocation6 + $0x78] sm:$0xff]  ;;  %v2069_v33 = vld [vmem:[#allocation6 + $0x60] sm:$0xff] }
 0x62a   :  { %v2571_v36 = vpop.eup %2570 }
 0x62b   :  { %2574 = vrcp.f32 %v1800_v34  ;;  %v1807_v41 = vadd.f32 1.0, %v2571_v36  ;;  %v2071_v34 = vld [vmem:[#allocation6 + $0x70] sm:$0xff]  ;;  %v2068_v36 = vld [vmem:[#allocation6 + $0x58] sm:$0xff] }
 0x62d   :  { %2576 = vrcp.f32 %v1807_v41  ;;  %v2064_v41 = vld [vmem:[#allocation6 + $0x38] sm:$0xff] }
 0x636   :  { %v2573_v37 = vpop.eup %2572 }
 0x637   :  { %v1812_v39 = vmul.f32 %v2573_v37, %v2569_v35  ;;  %v2066_v35 = vld [vmem:[#allocation6 + $0x48] sm:$0xff]  ;;  %v2065_v37 = vld [vmem:[#allocation6 + $0x40] sm:$0xff] }
 0x638   :  { %v2575_v40 = vpop.eup %2574 }
 0x639   :  { %v1811_v42 = vmul.f32 %v2575_v40, %v3548_v20  ;;  %v2106_v20 = vld [vmem:[#allocation6 + $0x188] sm:$0xff] }
 0x63a   :  { %v2577_v45 = vpop.eup %2576  ;;  %v2062_v40 = vld [vmem:[#allocation6 + $0x28] sm:$0xff] }
 0x63b   :  { %v3620_v43 = vadd.f32 %v1812_v39, %v1811_v42  ;;  %v2067_v39 = vld [vmem:[#allocation6 + $0x50] sm:$0xff]  ;;  %v2061_v42 = vld [vmem:[#allocation6 + $0x20] sm:$0xff] }
 0x63d   :  { %2578 = vtanh.f32 %v3620_v43 }
 0x64a   :  { %v2579_v48 = vpop.eup %2578 }
 0x64b   :  { %v1815_v3 = vmul.f32 %v2579_v48, %v2577_v45  ;;  %v2063_v45 = vld [vmem:[#allocation6 + $0x30] sm:$0xff]  ;;  %v2058_v48 = vld [vmem:[#allocation6 + $0x8] sm:$0xff] }
 0x64d   :  { %1948 = vmatmul.mubr.f32.vlgmr.msra.gmra.mxu0 %v1815_v3  ;;  %2019 = vmatmul.mubr.f32.vlgmr.msra.gmra.mxu1 %v1815_v3  ;;  %v2060_v3 = vld [vmem:[#allocation6 + $0x18] sm:$0xff] }
 0x64e   :  { %2185 = vmatprep.mubr.f32.mxu0 %v3895_v10  ;;  %2256 = vmatprep.mubr.f32.mxu1 %v3895_v10 }
 0x64f   :  { %2122 = vmatpush1.msra.mxu0 %v2117_v29  ;;  %2193 = vmatpush1.msra.mxu1 %v2119_v47  ;;  %v3901_v47 = vld [vmem:[#allocation51_spill] sm:$0xff] }
 0x650   :  { %2123 = vmatprep.subr.mxu0 %v2114_v52  ;;  %2194 = vmatprep.subr.mxu1 %v2116_v51 }
 0x651   :  { %2124 = vmatpush1.msra.mxu0 %v2113_v49  ;;  %2195 = vmatpush1.msra.mxu1 %v2115_v46  ;;  %v3902_v46 = vld [vmem:[#allocation53_spill] sm:$0xff] }
 0x652   :  { %2125 = vmatprep.subr.mxu0 %v2110_v63  ;;  %2196 = vmatprep.subr.mxu1 %v2112_v61 }
 0x653   :  { %2126 = vmatpush1.msra.mxu0 %v2109_v0  ;;  %2197 = vmatpush1.msra.mxu1 %v2111_v44 }
 0x654   :  { %2127 = vmatprep.subr.mxu0 %v2106_v20  ;;  %2198 = vmatprep.subr.mxu1 %v2108_v56  ;;  %v3903_v20 = vld [vmem:[#allocation54_spill] sm:$0xff] }
 0x655   :  { %2128 = vmatpush1.msra.mxu0 %v2105_v11  ;;  %2199 = vmatpush1.msra.mxu1 %v2107_v26  ;;  %v3904_v11 = vld [vmem:[#allocation52_spill] sm:$0xff] }
 0x656   :  { %2129 = vmatprep.subr.mxu0 %v2102_v59  ;;  %2200 = vmatprep.subr.mxu1 %v2104_v58 }
 0x657   :  { %2130 = vmatpush1.msra.mxu0 %v2101_v53  ;;  %2201 = vmatpush1.msra.mxu1 %v2103_v57 }
 0x658   :  { %2131 = vmatprep.subr.mxu0 %v2098_v55  ;;  %2202 = vmatprep.subr.mxu1 %v2100_v60 }
 0x659   :  { %2132 = vmatpush1.msra.mxu0 %v2097_v1  ;;  %2203 = vmatpush1.msra.mxu1 %v2099_v2 }
 0x65a   :  { %2133 = vmatprep.subr.mxu0 %v2094_v54  ;;  %2204 = vmatprep.subr.mxu1 %v2096_v38 }
 0x65b   :  { %2134 = vmatpush1.msra.mxu0 %v2093_v4  ;;  %2205 = vmatpush1.msra.mxu1 %v2095_v5 }
 0x65c   :  { %2135 = vmatprep.subr.mxu0 %v2090_v6  ;;  %2206 = vmatprep.subr.mxu1 %v2092_v7 }
 0x65d   :  { %2136 = vmatpush1.msra.mxu0 %v2089_v8  ;;  %2207 = vmatpush1.msra.mxu1 %v2091_v9 }
 0x65e   :  { %2137 = vmatprep.subr.mxu0 %v2086_v12  ;;  %2208 = vmatprep.subr.mxu1 %v2088_v13  ;;  %v2313_v12 = vld [vmem:[#allocation8 + $0x78] sm:$0xff]  ;;  %v2312_v13 = vld [vmem:[#allocation8 + $0x70] sm:$0xff] }
 0x65f   :  { %2138 = vmatpush1.msra.mxu0 %v2085_v14  ;;  %2209 = vmatpush1.msra.mxu1 %v2087_v15  ;;  %v2311_v14 = vld [vmem:[#allocation8 + $0x68] sm:$0xff]  ;;  %v2309_v15 = vld [vmem:[#allocation8 + $0x58] sm:$0xff] }
 0x660   :  { %2139 = vmatprep.subr.mxu0 %v2082_v16  ;;  %2210 = vmatprep.subr.mxu1 %v2084_v17  ;;  %v2308_v16 = vld [vmem:[#allocation8 + $0x50] sm:$0xff]  ;;  %v2307_v17 = vld [vmem:[#allocation8 + $0x48] sm:$0xff] }
 0x661   :  { %2140 = vmatpush1.msra.mxu0 %v2081_v18  ;;  %2211 = vmatpush1.msra.mxu1 %v2083_v19  ;;  %v2306_v18 = vld [vmem:[#allocation8 + $0x40] sm:$0xff]  ;;  %v2305_v19 = vld [vmem:[#allocation8 + $0x38] sm:$0xff] }
 0x662   :  { %2141 = vmatprep.subr.mxu0 %v2078_v21  ;;  %2212 = vmatprep.subr.mxu1 %v2080_v22  ;;  %v2304_v21 = vld [vmem:[#allocation8 + $0x30] sm:$0xff]  ;;  %v2303_v22 = vld [vmem:[#allocation8 + $0x28] sm:$0xff] }
 0x663   :  { %2142 = vmatpush1.msra.mxu0 %v2077_v23  ;;  %2213 = vmatpush1.msra.mxu1 %v2079_v24  ;;  %v2302_v23 = vld [vmem:[#allocation8 + $0x20] sm:$0xff]  ;;  %v2301_v24 = vld [vmem:[#allocation8 + $0x18] sm:$0xff] }
 0x664   :  { %2143 = vmatprep.subr.mxu0 %v2074_v25  ;;  %2214 = vmatprep.subr.mxu1 %v2076_v27  ;;  %v2300_v25 = vld [vmem:[#allocation8 + $0x10] sm:$0xff]  ;;  %v2299_v27 = vld [vmem:[#allocation8 + $0x8] sm:$0xff] }
 0x665   :  { %2144 = vmatpush1.msra.mxu0 %v2073_v28  ;;  %2215 = vmatpush1.msra.mxu1 %v2075_v30  ;;  %v2298_v28 = vld [vmem:[#allocation8] sm:$0xff] }
 0x666   :  { %2145 = vmatprep.subr.mxu0 %v2070_v31  ;;  %2216 = vmatprep.subr.mxu1 %v2072_v32  ;;  %v3905_v31 = vld [vmem:[#allocation55_spill] sm:$0xff] }
 0x667   :  { %2146 = vmatpush1.msra.mxu0 %v2069_v33  ;;  %2217 = vmatpush1.msra.mxu1 %v2071_v34 }
 0x668   :  { %2147 = vmatprep.subr.mxu0 %v2066_v35  ;;  %2218 = vmatprep.subr.mxu1 %v2068_v36  ;;  %v3906_v35 = vld [vmem:[#allocation57_spill] sm:$0xff] }
 0x669   :  { %2148 = vmatpush1.msra.mxu0 %v2065_v37  ;;  %2219 = vmatpush1.msra.mxu1 %v2067_v39 }
 0x66a   :  { %2149 = vmatprep.subr.mxu0 %v2062_v40  ;;  %2220 = vmatprep.subr.mxu1 %v2064_v41  ;;  %v3907_v41 = vld [vmem:[#allocation58_spill] sm:$0xff] }
 0x66b   :  { %2150 = vmatpush1.msra.mxu0 %v2061_v42  ;;  %2221 = vmatpush1.msra.mxu1 %v2063_v45  ;;  %v3908_v45 = vld [vmem:[#allocation56_spill] sm:$0xff] }
 0x66c   :  { %2151 = vmatprep.subr.mxu0 %v2058_v48  ;;  %2222 = vmatprep.subr.mxu1 %v2060_v3 }
 0x66d   :  { %2152 = vmatpush1.msra.mxu0 %v2057_v50  ;;  %2223 = vmatpush1.msra.mxu1 %v2059_v62 }
 0x66e   :  { %2440 = vmatprep.subr.mxu0 %v3895_v10 }
 0x70d   :  { %v1949_v29 = vpop.f32.mrf.mxu0  ;;  %v2020_v61 = vpop.f32.mrf.mxu1 }
 0x70e   :  { %v2025_v52 = vadd.f32 %v1949_v29, %v3901_v47  ;;  %v2027_v26 = vadd.f32 %v2020_v61, %v3904_v11  ;;  %v2422_v11 = vld [vmem:[%s3666_s5] ss:$0 sm:$0xff] }
 0x70f   :  { %v1951_v51 = vpop.f32.mrf.mxu0  ;;  %v2022_v44 = vpop.f32.mrf.mxu1 }
 0x710   :  { %v2416_v49 = vmul.f32 -1.442695, %v2025_v52  ;;  %v2026_v63 = vadd.f32 %v1951_v51, %v3902_v46  ;;  %v2028_v56 = vadd.f32 %v2022_v44, %v3903_v20 }
 0x712   :  { %2580 = vpow2.f32 %v2416_v49  ;;  %v2417_v0 = vmul.f32 -1.442695, %v2026_v63  ;;  %v2418_v59 = vmul.f32 -1.442695, %v2028_v56 }
 0x714   :  { %2582 = vpow2.f32 %v2417_v0 }
 0x715   :  { %2584 = vtanh.f32 %v2027_v26 }
 0x716   :  { %2586 = vpow2.f32 %v2418_v59 }
 0x71f   :  { %v2581_v58 = vpop.eup %2580 }
 0x720   :  { %v2032_v53 = vadd.f32 1.0, %v2581_v58 }
 0x721   :  { %v2583_v57 = vpop.eup %2582 }
 0x722   :  { %2588 = vrcp.f32 %v2032_v53  ;;  %v2038_v55 = vadd.f32 1.0, %v2583_v57  ;;  %v2585_v60 = vpop.eup %2584 }
 0x723   :  { %v2587_v1 = vpop.eup %2586 }
 0x724   :  { %2590 = vrcp.f32 %v2038_v55  ;;  %v2045_v4 = vadd.f32 1.0, %v2587_v1 }
 0x726   :  { %2592 = vrcp.f32 %v2045_v4 }
 0x72f   :  { %v2589_v2 = vpop.eup %2588 }
 0x730   :  { %v2050_v54 = vmul.f32 %v2589_v2, %v2585_v60 }
 0x731   :  { %v2591_v38 = vpop.eup %2590 }
 0x732   :  { %v2049_v5 = vmul.f32 %v2591_v38, %v3620_v43  ;;  %v2310_v43 = vld [vmem:[#allocation8 + $0x60] sm:$0xff] }
 0x733   :  { %v2593_v7 = vpop.eup %2592 }
 0x734   :  { %v3631_v6 = vadd.f32 %v2050_v54, %v2049_v5 }
 0x736   :  { %2594 = vtanh.f32 %v3631_v6 }
 0x743   :  { %v2595_v8 = vpop.eup %2594 }
 0x744   :  { %v2053_v9 = vmul.f32 %v2595_v8, %v2593_v7 }
 0x746   :  { %2186 = vmatmul.mubr.f32.vlgmr.msra.gmra.mxu0 %v2053_v9  ;;  %2257 = vmatmul.mubr.f32.vlgmr.msra.gmra.mxu1 %v2053_v9 }
 0x747   :  { %2441 = vmatpush3.msra.mxu0 %v2313_v12  ;;  %2472 = vmatprep.mubr.msk.f32.mxu0 %vm2684_vm0, %v3895_v10 }
 0x748   :  { %2442 = vmatprep.subr.mxu0 %v3895_v10 }
 0x749   :  { %2443 = vmatpush3.msra.mxu0 %v2312_v13 }
 0x74a   :  { %2444 = vmatprep.subr.mxu0 %v3895_v10 }
 0x74b   :  { %2445 = vmatpush3.msra.mxu0 %v2311_v14 }
 0x74c   :  { %2446 = vmatprep.subr.mxu0 %v3895_v10 }
 0x74d   :  { %2447 = vmatpush3.msra.mxu0 %v2310_v43 }
 0x74e   :  { %2448 = vmatprep.subr.mxu0 %v3895_v10 }
 0x74f   :  { %2449 = vmatpush3.msra.mxu0 %v2309_v15 }
 0x750   :  { %2450 = vmatprep.subr.mxu0 %v3895_v10 }
 0x751   :  { %2451 = vmatpush3.msra.mxu0 %v2308_v16 }
 0x752   :  { %2452 = vmatprep.subr.mxu0 %v3895_v10 }
 0x753   :  { %2453 = vmatpush3.msra.mxu0 %v2307_v17 }
 0x754   :  { %2454 = vmatprep.subr.mxu0 %v3895_v10 }
 0x755   :  { %2455 = vmatpush3.msra.mxu0 %v2306_v18 }
 0x756   :  { %2456 = vmatprep.subr.mxu0 %v3895_v10 }
 0x757   :  { %2457 = vmatpush3.msra.mxu0 %v2305_v19 }
 0x758   :  { %2458 = vmatprep.subr.mxu0 %v3895_v10 }
 0x759   :  { %2459 = vmatpush3.msra.mxu0 %v2304_v21 }
 0x75a   :  { %2460 = vmatprep.subr.mxu0 %v3895_v10 }
 0x75b   :  { %2461 = vmatpush3.msra.mxu0 %v2303_v22 }
 0x75c   :  { %2462 = vmatprep.subr.mxu0 %v3895_v10 }
 0x75d   :  { %2463 = vmatpush3.msra.mxu0 %v2302_v23 }
 0x75e   :  { %2464 = vmatprep.subr.mxu0 %v3895_v10 }
 0x75f   :  { %2465 = vmatpush3.msra.mxu0 %v2301_v24 }
 0x760   :  { %2466 = vmatprep.subr.mxu0 %v3895_v10 }
 0x761   :  { %2467 = vmatpush3.msra.mxu0 %v2300_v25 }
 0x762   :  { %2468 = vmatprep.subr.mxu0 %v3895_v10 }
 0x763   :  { %2469 = vmatpush3.msra.mxu0 %v2299_v27 }
 0x764   :  { %2470 = vmatprep.subr.mxu0 %v3895_v10 }
 0x765   :  { %2471 = vmatpush3.msra.mxu0 %v2298_v28 }
 0x806   :  { %v2187_v30 = vpop.f32.mrf.mxu0  ;;  %v2258_v37 = vpop.f32.mrf.mxu1 }
 0x807   :  { %v2263_v32 = vadd.f32 %v2187_v30, %v3905_v31  ;;  %v2265_v48 = vadd.f32 %v2258_v37, %v3908_v45 }
 0x808   :  { %v2189_v33 = vpop.f32.mrf.mxu0  ;;  %v2260_v40 = vpop.f32.mrf.mxu1 }
 0x809   :  { %v2419_v34 = vmul.f32 -1.442695, %v2263_v32  ;;  %v2264_v36 = vadd.f32 %v2189_v33, %v3906_v35  ;;  %v2266_v42 = vadd.f32 %v2260_v40, %v3907_v41 }
 0x80b   :  { %2596 = vpow2.f32 %v2419_v34  ;;  %v2420_v39 = vmul.f32 -1.442695, %v2264_v36  ;;  %v2421_v3 = vmul.f32 -1.442695, %v2266_v42 }
 0x80d   :  { %2598 = vpow2.f32 %v2420_v39 }
 0x80e   :  { %2600 = vtanh.f32 %v2265_v48 }
 0x80f   :  { %2602 = vpow2.f32 %v2421_v3 }
 0x818   :  { %v2597_v50 = vpop.eup %2596 }
 0x819   :  { %v2270_v10 = vadd.f32 1.0, %v2597_v50 }
 0x81a   :  { %v2599_v62 = vpop.eup %2598 }
 0x81b   :  { %2604 = vrcp.f32 %v2270_v10  ;;  %v2276_v29 = vadd.f32 1.0, %v2599_v62  ;;  %v2601_v47 = vpop.eup %2600 }
 0x81c   :  { %v2603_v52 = vpop.eup %2602 }
 0x81d   :  { %2606 = vrcp.f32 %v2276_v29  ;;  %v2283_v63 = vadd.f32 1.0, %v2603_v52 }
 0x81f   :  { %2608 = vrcp.f32 %v2283_v63 }
 0x828   :  { %v2605_v51 = vpop.eup %2604 }
 0x829   :  { %v2288_v49 = vmul.f32 %v2605_v51, %v2601_v47 }
 0x82a   :  { %v2607_v46 = vpop.eup %2606 }
 0x82b   :  { %v2287_v61 = vmul.f32 %v2607_v46, %v3631_v6 }
 0x82c   :  { %v2609_v44 = vpop.eup %2608 }
 0x82d   :  { %v2289_v0 = vadd.f32 %v2288_v49, %v2287_v61 }
 0x82f   :  { %2610 = vtanh.f32 %v2289_v0 }
 0x83c   :  { %v2611_v20 = vpop.eup %2610 }
 0x83d   :  { %v2291_v56 = vmul.f32 %v2611_v20, %v2609_v44 }
 0x83f   :  { %2473 = vmatmul.mubr.f32.vlgmr.msra.gmra.mxu0 %v2291_v56 }
 0x8ff   :  { %v2387_v26 = vpop.f32.mrf.mxu0 }
 0x900   :  { %v2388_v59 = vadd.f32 %v2422_v11, %v2387_v26 }
 0x901   :  { %v2474_v58 = vpop.f32.mrf.mxu0 }
 0x902   :  { %2391 = vst [vmem:[%s3667_s6] sm:$0xff] %v2388_v59 }
 0x903   :  { %2396 = vsyncpa [#allocation5], 1 }
 0x904   :  { %2397 = vsyncpa [#allocation7], 1 }

</bundles_post_ra>
